<compile_context>
chip_gen: v6e
topology: v6e:2x2x1
jax: 0.10.0
libtpu: 0.0.40
codegen_flags: <defaults>
</compile_context>

<pallas_src>
import numpy as np
import jax
import jax.numpy as jnp
from jax.experimental import pallas as pl
from jax.experimental.pallas import tpu as pltpu

BETA = 1.0  # SoftDecisionTree.BETA


def build_tree_routes(depth: int):
    """Mirror SoftDecisionTree._init_tree: preorder internal nodes, left-to-right leaves.
    Returns (num_internal, num_leaves, route_pos, route_neg) where
    route_pos[n, l] = 1 if leaf l is reached through the RIGHT branch of internal node n,
    route_neg[n, l] = 1 if through the LEFT branch, 0 if node n is not on leaf l's path."""
    paths = []
    counter = [0]

    def rec(d, path):
        if d == 1:
            paths.append(list(path))
            return
        idx = counter[0]
        counter[0] += 1
        rec(d - 1, path + [(idx, 0)])  # left  -> factor (1 - ps)
        rec(d - 1, path + [(idx, 1)])  # right -> factor ps

    rec(depth, [])
    n_int, n_leaves = counter[0], len(paths)
    rp = np.zeros((n_int, n_leaves), np.float32)
    rn = np.zeros((n_int, n_leaves), np.float32)
    for l, path in enumerate(paths):
        for (n, d) in path:
            if d == 1:
                rp[n, l] = 1.0
            else:
                rn[n, l] = 1.0
    return n_int, n_leaves, rp, rn


def _log_sigmoid(x):
    # Numerically stable log(sigmoid(x)) = min(x, 0) - log(1 + exp(-|x|)).
    # (jnp.log1p would tighten the tail slightly, but the downstream argmax is
    #  insensitive at this scale and log/exp lower cleanly everywhere.)
    return jnp.minimum(x, 0.0) - jnp.log(1.0 + jnp.exp(-jnp.abs(x)))


def _round_up(v, m):
    return ((v + m - 1) // m) * m


def _vmem_budget_and_limit():
    """Generation-aware tile budget and explicit scoped-VMEM limit."""
    try:
        kind = jax.devices()[0].device_kind.lower()
    except Exception:
        kind = ""
    if "v5" in kind:                 # v5e default scoped VMEM is 16 MiB: stay under it
        budget = 12 << 20
    else:                            # v6e / v7x
        budget = 24 << 20
    return budget, budget + (8 << 20)


# ---------------------------------------------------------------------------
# Routing + leaf-selection kernel (Leaf.dist() softmax computed inline).
# ---------------------------------------------------------------------------
def make_sdt_forward(depth: int, k: int, in_features: int, tb: int = 2048,
                     use_bf16: bool = False):
    n_int, n_leaves, rp, rn = build_tree_routes(depth)

    # Fused routing matrix:  log_pa = [log_ps, -beta*z] @ R,  R = [[rp+rn], [rn]],
    # using log sigma(-x) = log sigma(x) - x  (one EUP pass, one MXU push per step).
    R = jnp.asarray(np.concatenate([rp + rn, rn], axis=0), jnp.float32)   # (2*n_int, n_leaves)

    x_item = 2 if use_bf16 else 4
    row_align = 16 if use_bf16 else 8
    vmem_budget, vmem_limit = _vmem_budget_and_limit()

    # Double-buffered replicated constants (W, b, R, leaf_logits).
    const_bytes = 2 * (x_item * in_features * n_int
                       + 4 * n_int
                       + 4 * 2 * n_int * n_leaves
                       + 4 * n_leaves * k)

    def footprint(t):
        # Double-buffered x and out tiles + constants (intermediates are covered by
        # the headroom between vmem_budget and vmem_limit).
        return 2 * (x_item * t * in_features + 4 * t * k) + const_bytes

    def kernel(x_ref, w_ref, b_ref, r_ref, leaf_ref, out_ref):
        x = x_ref[...]                                    # (tb, F)  f32 or bf16
        w = w_ref[...]                                    # (F, n_int)

        # Decision-node outputs z = Linear(xs); accumulate in f32 on the MXU.
        z = jnp.dot(x, w, preferred_element_type=jnp.float32) + b_ref[...]   # (tb, n_int)
        bz = BETA * z
        log_ps = _log_sigmoid(bz)                         # log sigmoid(beta*z)  (right turns)
        # log sigmoid(-beta*z) = log_ps - bz  -> folded into the fused matmul below.

        # Log path-probability of every leaf in ONE MXU push (monotone in pa, so the
        # argmax leaf matches the product-form reference).
        lhs = jnp.concatenate([log_ps, -bz], axis=1)      # (tb, 2*n_int)
        log_pa = jnp.dot(lhs, r_ref[...], preferred_element_type=jnp.float32)  # (tb, n_leaves)

        # argmax over leaves (first occurrence, matching torch/jnp argmax semantics).
        t_rows = log_pa.shape[0]
        max_lpa = jnp.max(log_pa, axis=1, keepdims=True)
        lane = jax.lax.broadcasted_iota(jnp.int32, (t_rows, n_leaves), 1)
        ix = jnp.min(jnp.where(log_pa >= max_lpa, lane, n_leaves), axis=1, keepdims=True)
        onehot = (lane == ix).astype(jnp.float32)         # (tb, n_leaves)

        # Leaf.dist(): softmax over each leaf's dist_params. Tiny (n_leaves x k), done
        # inline every step -> no separate pallas_call launch, no extra HBM array, and
        # safe when the grid axis is sharded across TensorCores.
        ll = leaf_ref[...]                                # (n_leaves, k)
        e = jnp.exp(ll - jnp.max(ll, axis=-1, keepdims=True))
        dist = e / jnp.sum(e, axis=-1, keepdims=True)

        # Gather the argmax leaf's distribution per sample via one-hot matmul.
        # TODO(synk): out lane width is k (<128) -> masked partial stores; only worth a
        # lane-dense/transposed layout if profiling shows a store-side wall-compute gap
        # (output bytes are ~6x smaller than the x read here).
        out_ref[...] = jnp.dot(onehot, dist, preferred_element_type=jnp.float32)

    def forward(xs, W, b, leaf_logits):
        batch = int(xs.shape[0])

        x_in, w_in = xs, W
        if use_bf16:
            # Cast at the pallas_call boundary so the x BlockSpec DMAs bf16 (half the
            # HBM bytes for the dominant stream). Ideally the caller already holds
            # xs/W in bf16 so these casts are no-ops.
            x_in = x_in.astype(jnp.bfloat16)
            w_in = w_in.astype(jnp.bfloat16)

        # Batch tile: as large as the VMEM budget allows, but keep >=2 grid steps so
        # dimension_semantics=("parallel",) can shard across both v7x TensorCores.
        t = min(int(tb), _round_up(pl.cdiv(batch, 2), row_align))
        t = max(row_align, _round_up(t, row_align))
        while t > row_align and footprint(t) > vmem_budget:
            t //= 2
        t = max(row_align, (t // row_align) * row_align)

        # No jnp.pad / output slice: Pallas masks the edge block at batch % t != 0.
        grid = (pl.cdiv(batch, t),)

        call = pl.pallas_call(
            kernel,
            out_shape=jax.ShapeDtypeStruct((batch, k), jnp.float32),
            grid_spec=pltpu.PrefetchScalarGridSpec(
                num_scalar_prefetch=0,
                grid=grid,
                in_specs=[
                    # x: the only large stream. If profiling ever shows exposed input
                    # DMA at large t, add pipeline_mode=pl.Buffered(3) here.
                    pl.BlockSpec((t, in_features), lambda i: (i, 0)),     # xs tile over batch
                    pl.BlockSpec((in_features, n_int), lambda i: (0, 0)),  # W
                    pl.BlockSpec((1, n_int), lambda i: (0, 0)),            # b
                    pl.BlockSpec((2 * n_int, n_leaves), lambda i: (0, 0)),  # fused routes R
                    pl.BlockSpec((n_leaves, k), lambda i: (0, 0)),          # leaf dist_params
                ],
                out_specs=pl.BlockSpec((t, k), lambda i: (i, 0)),
            ),
            compiler_params=pltpu.CompilerParams(
                dimension_semantics=("parallel",),
                vmem_limit_bytes=vmem_limit,
            ),
        )
        return call(x_in, w_in, b, R, leaf_logits)

    return forward


def reference_forward(xs, W, b, leaf_logits, rp, rn):
    """Pure-JAX reference of the same 'max'-mode forward (original product form)."""
    z = xs @ W + b
    ps = jax.nn.sigmoid(BETA * z)
    pa = jnp.ones((xs.shape[0], rp.shape[1]), jnp.float32)
    for n in range(rp.shape[0]):
        p_n = ps[:, n:n + 1]
        pa = pa * (1.0 + rp[n][None, :] * (p_n - 1.0) - rn[n][None, :] * p_n)
    ix = jnp.argmax(pa, axis=1)
    dist = jax.nn.softmax(leaf_logits, axis=-1)
    return dist[ix]


if __name__ == "__main__":
    # Small but non-trivial shapes: xs is (batch, w*h); batch=300 with the >=2-step tile
    # rule gives tb=152 and a 2-step "parallel" grid whose second block is partial,
    # exercising the no-pad edge-masking path.
    depth, k, in_features, batch = 4, 10, 64, 300
    n_int, n_leaves, rp_np, rn_np = build_tree_routes(depth)

    key = jax.random.PRNGKey(0)
    kx, kw, kb, kl = jax.random.split(key, 4)
    xs = jax.random.normal(kx, (batch, in_features), jnp.float32)
    # Deterministic synthetic parameters (shapes from the module's __init__):
    #   each Branch: Linear(in_features, 1)  -> stacked W (in_features, n_int), b (1, n_int)
    #   each Leaf:   dist_params of shape (k,) -> stacked (n_leaves, k)
    W = jax.random.normal(kw, (in_features, n_int), jnp.float32) / np.sqrt(in_features)
    b = 0.1 * jax.random.normal(kb, (1, n_int), jnp.float32)
    leaf_logits = jax.random.normal(kl, (n_leaves, k), jnp.float32)

    # f32 path is validated below. use_bf16=True halves x HBM bytes on v6e/v7x, but
    # near-tied path probabilities can flip the argmax leaf (a discrete change), so it
    # stays opt-in and is not asserted here.
    sdt_forward = make_sdt_forward(depth, k, in_features, tb=2048, use_bf16=False)
    out = jax.block_until_ready(sdt_forward(xs, W, b, leaf_logits))

    ref = reference_forward(xs, W, b, leaf_logits, jnp.asarray(rp_np), jnp.asarray(rn_np))
    assert out.shape == (batch, k)
    assert np.allclose(np.asarray(out), np.asarray(ref), rtol=1e-4, atol=1e-5)
    # TODO(synk): the per-node `attr` bookkeeping dict (pa/ps/ds side outputs) is not
    # returned; only the forward() output distributions are produced by the kernel.
    print("KERNEL_OK")
</pallas_src>

<mosaic_0001>
module attributes {stable_mosaic.version = 11 : i64} {
  func.func @kernel(%arg0: i32, %arg1: memref<152x64xf32, #tpu.memory_space<vmem>>, %arg2: memref<64x7xf32, #tpu.memory_space<vmem>>, %arg3: memref<1x7xf32, #tpu.memory_space<vmem>>, %arg4: memref<14x8xf32, #tpu.memory_space<vmem>>, %arg5: memref<8x10xf32, #tpu.memory_space<vmem>>, %arg6: memref<152x10xf32, #tpu.memory_space<vmem>>) attributes {dimension_semantics = [#tpu.dimension_semantics<parallel>], iteration_bounds = array<i64: 2>, scalar_prefetch = 0 : i64, scratch_operands = 0 : i64, tpu.core_type = #tpu.core_type<tc>, window_params = [{transform_indices = @transform_0, window_bounds = array<i64: 152, 64>}, {pipeline_mode = #tpu.pipeline_mode<synchronous>, transform_indices = @transform_1, window_bounds = array<i64: 64, 7>}, {pipeline_mode = #tpu.pipeline_mode<synchronous>, transform_indices = @transform_2, window_bounds = array<i64: 1, 7>}, {pipeline_mode = #tpu.pipeline_mode<synchronous>, transform_indices = @transform_3, window_bounds = array<i64: 14, 8>}, {pipeline_mode = #tpu.pipeline_mode<synchronous>, transform_indices = @transform_4, window_bounds = array<i64: 8, 10>}, {transform_indices = @transform_5, window_bounds = array<i64: 152, 10>}]} {
    %c0 = arith.constant 0 : index
    %c0_0 = arith.constant 0 : index
    %0 = vector.load %arg1[%c0, %c0_0] : memref<152x64xf32, #tpu.memory_space<vmem>>, vector<152x64xf32>
    %c0_1 = arith.constant 0 : index
    %c0_2 = arith.constant 0 : index
    %1 = vector.load %arg2[%c0_1, %c0_2] : memref<64x7xf32, #tpu.memory_space<vmem>>, vector<64x7xf32>
    %cst = arith.constant dense<0.000000e+00> : vector<152x7xf32>
    %2 = tpu.matmul %0, %1, %cst {dimension_numbers = #tpu.dot_dimension_numbers<[1], [0], [0], [1], [0, 0, 1, 1], [], []>} : vector<152x64xf32>, vector<64x7xf32>, vector<152x7xf32> -> vector<152x7xf32>
    %c0_3 = arith.constant 0 : index
    %c0_4 = arith.constant 0 : index
    %3 = vector.load %arg3[%c0_3, %c0_4] : memref<1x7xf32, #tpu.memory_space<vmem>>, vector<1x7xf32>
    %4 = vector.broadcast %3 : vector<1x7xf32> to vector<152x7xf32>
    %5 = arith.addf %2, %4 : vector<152x7xf32>
    %cst_5 = arith.constant 1.000000e+00 : f32
    %6 = vector.broadcast %cst_5 : f32 to vector<152x7xf32>
    %7 = arith.mulf %6, %5 : vector<152x7xf32>
    %cst_6 = arith.constant 0.000000e+00 : f32
    %8 = vector.broadcast %cst_6 : f32 to vector<152x7xf32>
    %9 = arith.minimumf %7, %8 : vector<152x7xf32>
    %10 = math.absf %7 : vector<152x7xf32>
    %cst_7 = arith.constant 0.000000e+00 : f32
    %11 = vector.broadcast %cst_7 : f32 to vector<152x7xf32>
    %12 = arith.subf %11, %10 : vector<152x7xf32>
    %13 = math.exp %12 : vector<152x7xf32>
    %cst_8 = arith.constant 1.000000e+00 : f32
    %14 = vector.broadcast %cst_8 : f32 to vector<152x7xf32>
    %15 = arith.addf %14, %13 : vector<152x7xf32>
    %16 = math.log %15 : vector<152x7xf32>
    %17 = arith.subf %9, %16 : vector<152x7xf32>
    %cst_9 = arith.constant 0.000000e+00 : f32
    %18 = vector.broadcast %cst_9 : f32 to vector<152x7xf32>
    %19 = arith.subf %18, %7 : vector<152x7xf32>
    %20 = tpu.concatenate %17, %19 in 1 : vector<152x7xf32>, vector<152x7xf32> -> vector<152x14xf32>
    %c0_10 = arith.constant 0 : index
    %c0_11 = arith.constant 0 : index
    %21 = vector.load %arg4[%c0_10, %c0_11] : memref<14x8xf32, #tpu.memory_space<vmem>>, vector<14x8xf32>
    %cst_12 = arith.constant dense<0.000000e+00> : vector<152x8xf32>
    %22 = tpu.matmul %20, %21, %cst_12 {dimension_numbers = #tpu.dot_dimension_numbers<[1], [0], [0], [1], [0, 0, 1, 1], [], []>} : vector<152x14xf32>, vector<14x8xf32>, vector<152x8xf32> -> vector<152x8xf32>
    %cst_13 = arith.constant dense<0xFF800000> : vector<152xf32>
    %23 = vector.multi_reduction <maximumf>, %22, %cst_13 [1] : vector<152x8xf32> to vector<152xf32>
    %24 = vector.shape_cast %23 : vector<152xf32> to vector<152x1xf32>
    %25 = tpu.iota {dimensions = array<i32: 1>} : vector<152x8xi32>
    %26 = vector.broadcast %24 : vector<152x1xf32> to vector<152x8xf32>
    %27 = arith.cmpf oge, %22, %26 : vector<152x8xf32>
    %c8_i32 = arith.constant 8 : i32
    %28 = vector.broadcast %c8_i32 : i32 to vector<152x8xi32>
    %29 = arith.select %27, %25, %28 : vector<152x8xi1>, vector<152x8xi32>
    %cst_14 = arith.constant dense<2147483647> : vector<152xi32>
    %30 = vector.multi_reduction <minsi>, %29, %cst_14 [1] : vector<152x8xi32> to vector<152xi32>
    %31 = vector.shape_cast %30 : vector<152xi32> to vector<152x1xi32>
    %32 = vector.broadcast %31 : vector<152x1xi32> to vector<152x8xi32>
    %33 = arith.cmpi eq, %25, %32 : vector<152x8xi32>
    %34 = arith.extui %33 : vector<152x8xi1> to vector<152x8xi32>
    %35 = arith.sitofp %34 : vector<152x8xi32> to vector<152x8xf32>
    %c0_15 = arith.constant 0 : index
    %c0_16 = arith.constant 0 : index
    %36 = vector.load %arg5[%c0_15, %c0_16] : memref<8x10xf32, #tpu.memory_space<vmem>>, vector<8x10xf32>
    %cst_17 = arith.constant dense<0xFF800000> : vector<8xf32>
    %37 = vector.multi_reduction <maximumf>, %36, %cst_17 [1] : vector<8x10xf32> to vector<8xf32>
    %38 = vector.shape_cast %37 : vector<8xf32> to vector<8x1xf32>
    %39 = vector.broadcast %38 : vector<8x1xf32> to vector<8x10xf32>
    %40 = arith.subf %36, %39 : vector<8x10xf32>
    %41 = math.exp %40 : vector<8x10xf32>
    %cst_18 = arith.constant dense<0.000000e+00> : vector<8xf32>
    %42 = vector.multi_reduction <add>, %41, %cst_18 [1] : vector<8x10xf32> to vector<8xf32>
    %43 = vector.shape_cast %42 : vector<8xf32> to vector<8x1xf32>
    %44 = vector.broadcast %43 : vector<8x1xf32> to vector<8x10xf32>
    %45 = arith.divf %41, %44 : vector<8x10xf32>
    %cst_19 = arith.constant dense<0.000000e+00> : vector<152x10xf32>
    %46 = tpu.matmul %35, %45, %cst_19 {dimension_numbers = #tpu.dot_dimension_numbers<[1], [0], [0], [1], [0, 0, 1, 1], [], []>} : vector<152x8xf32>, vector<8x10xf32>, vector<152x10xf32> -> vector<152x10xf32>
    %c0_20 = arith.constant 0 : index
    %c0_21 = arith.constant 0 : index
    %47 = vector.load %arg6[%c0_20, %c0_21] : memref<152x10xf32, #tpu.memory_space<vmem>>, vector<152x10xf32>
    tpu.vector_store %arg6[%c0_20, %c0_21], %46 {strides = array<i32>} : memref<152x10xf32, #tpu.memory_space<vmem>>, vector<152x10xf32>,
    return
  }
  func.func @transform_0(%arg0: i32) -> (i32, i32) {
    %c0_i32 = arith.constant 0 : i32
    %c0_i32_0 = arith.constant 0 : i32
    return %arg0, %c0_i32 : i32, i32
  }
  func.func @transform_1(%arg0: i32) -> (i32, i32) {
    %c0_i32 = arith.constant 0 : i32
    %c0_i32_0 = arith.constant 0 : i32
    %c0_i32_1 = arith.constant 0 : i32
    return %c0_i32, %c0_i32_0 : i32, i32
  }
  func.func @transform_2(%arg0: i32) -> (i32, i32) {
    %c0_i32 = arith.constant 0 : i32
    %c0_i32_0 = arith.constant 0 : i32
    %c0_i32_1 = arith.constant 0 : i32
    return %c0_i32, %c0_i32_0 : i32, i32
  }
  func.func @transform_3(%arg0: i32) -> (i32, i32) {
    %c0_i32 = arith.constant 0 : i32
    %c0_i32_0 = arith.constant 0 : i32
    %c0_i32_1 = arith.constant 0 : i32
    return %c0_i32, %c0_i32_0 : i32, i32
  }
  func.func @transform_4(%arg0: i32) -> (i32, i32) {
    %c0_i32 = arith.constant 0 : i32
    %c0_i32_0 = arith.constant 0 : i32
    %c0_i32_1 = arith.constant 0 : i32
    return %c0_i32, %c0_i32_0 : i32, i32
  }
  func.func @transform_5(%arg0: i32) -> (i32, i32) {
    %c0_i32 = arith.constant 0 : i32
    %c0_i32_0 = arith.constant 0 : i32
    return %arg0, %c0_i32 : i32, i32
  }
}

</mosaic_0001>

<bundles_post_ra>
// kernel: tpu_custom_call.1
= control target key start
LH: loop header
LB: loop body
LE: loop exit
PB: predicated region body
PF: predicated region fallthrough
CT: control target
= control target key end

     0   :  { %s2219_s18 = smov 0   ;;  %s3089_s0 = inlined_call_operand.vmem [shape: f32[300,64], index: 0, kind: input, shape index: {}]   ;;  %s3090_s1 = inlined_call_operand.vmem [shape: f32[64,7], index: 1, kind: input, shape index: {}]   ;;  %s3091_s2 = inlined_call_operand.vmem [shape: f32[1,7], index: 2, kind: input, shape index: {}]   ;;  %s3092_s3 = inlined_call_operand.vmem [shape: f32[14,8], index: 3, kind: input, shape index: {}]   ;;  %s3093_s4 = inlined_call_operand.vmem [shape: f32[8,10], index: 4, kind: input, shape index: {}]   ;;  %s3094_s5 = inlined_call_operand.vmem [shape: f32[300,10], index: 5, kind: output, shape index: {}]  }
   0x1 LB: > { %s1735_s19 = sadd.s32 4294967295, %s2184_s18   ;;  %p1739_p0 = scmp.ge.s32.totalorder %s2184_s18, 1  ;;  %s2184_s18 = sphi %s2219_s18, %s15_s18  }
   0x2   : > { %p188_p1 = scmp.lt.s32.totalorder %s2184_s18, 3 }
   0x4   : > { %p189_p2 = pnand %p1739_p0, %p188_p1 }
   0x5   : > { %s216_s22 = smul.u32 (!%p189_p2), 19, %s1735_s19  ;;  %s2188_s24 = smov (!%p189_p2), 7  }
   0x6   : > { %192 = sbr.rel (%p189_p2) target bundleno = 1231 (0x4cf), region = 40 }
   0x7   : > { %p217_p3 = scmp.lt.s32.totalorder (!%p189_p2), %s216_s22, 37 }
   0xb   : > { %v254_v0 = vld [vmem:[%s3090_s1 + $0x38] sm:$0xff]  ;;  %v2186_v1 = vmov 0.0   ;;  %v253_v2 = vld [vmem:[%s3090_s1 + $0x30] sm:$0xff]  ;;  %vm2187_vm0 = vmmov 0   ;;  %v252_v3 = vld [vmem:[%s3090_s1 + $0x28] sm:$0xff]  ;;  %s3096_s22 = smov (!%p217_p3, %s216_s22), 37 }
   0xc   : > { %1890 = vmatprep.subr.mxu0 %v2186_v1  ;;  %1906 = vmatprep.mubr.msk.f32.mxu0 %vm2187_vm0, %v2186_v1  ;;  %v251_v4 = vld [vmem:[%s3090_s1 + $0x20] sm:$0xff]  ;;  %v250_v5 = vld [vmem:[%s3090_s1 + $0x18] sm:$0xff]  ;;  %s1740_s6 = sshll.u32 %s3096_s22, 3  ;;  %v249_v6 = vld [vmem:[%s3090_s1 + $0x10] sm:$0xff]  ;;  %vm262_vm1 = vcmask 523264   ;;  %vm826_vm2 = vcmask 1045504  }
   0xd   : > { %1891 = vmatpush3.msra.mxu0 %v254_v0  ;;  %2083 = vmatprep.subr.mxu1 %v2186_v1  ;;  %v248_v7 = vld [vmem:[%s3090_s1 + $0x8] sm:$0xff]  ;;  %s2267_s13 = scalar_lea.vmem %s3089_s0, %s1740_s6  ;;  %v247_v8 = vld [vmem:[%s3090_s1] sm:$0xff]  ;;  %vm746_vm3 = vcmask 56320   ;;  %vm768_vm4 = vcmask 113664   ;;  %vm990_vm5 = vcmask 64512   ;;  %vm1431_vm6 = vcmask 80896   ;;  %s3046_s29 = scalar_lea.vmem %s3094_s5, %s1740_s6 }
   0xe   : > { %1892 = vmatprep.subr.mxu0 %v2186_v1  ;;  %1991 = vmatprep.mubr.msk.f32.mxu1 %vm2187_vm0, %v2186_v1  ;;  %v228_v9 = vld [vmem:[%s2267_s13] sm:$0xff]  ;;  %v229_v10 = vld [vmem:[%s2267_s13 + $0x8] sm:$0xff]  ;;  %v230_v11 = vld [vmem:[%s2267_s13 + $0x10] sm:$0xff] }
   0xf   : > { %1893 = vmatpush3.msra.mxu0 %v253_v2  ;;  %v231_v12 = vld [vmem:[%s2267_s13 + $0x18] sm:$0xff]  ;;  %v232_v13 = vld [vmem:[%s2267_s13 + $0x20] sm:$0xff]  ;;  %v233_v14 = vld [vmem:[%s2267_s13 + $0x28] sm:$0xff] }
  0x10   : > { %1894 = vmatprep.subr.mxu0 %v2186_v1  ;;  %v234_v15 = vld [vmem:[%s2267_s13 + $0x30] sm:$0xff]  ;;  %v235_v16 = vld [vmem:[%s2267_s13 + $0x38] sm:$0xff]  ;;  %v236_v17 = vld [vmem:[%s2267_s13 + $0x40] sm:$0xff] }
  0x11   : > { %1895 = vmatpush3.msra.mxu0 %v252_v3  ;;  %v237_v18 = vld [vmem:[%s2267_s13 + $0x48] sm:$0xff]  ;;  %v238_v19 = vld [vmem:[%s2267_s13 + $0x50] sm:$0xff]  ;;  %v239_v20 = vld [vmem:[%s2267_s13 + $0x58] sm:$0xff] }
  0x12   : > { %1896 = vmatprep.subr.mxu0 %v2186_v1  ;;  %v240_v21 = vld [vmem:[%s2267_s13 + $0x60] sm:$0xff]  ;;  %v241_v22 = vld [vmem:[%s2267_s13 + $0x68] sm:$0xff]  ;;  %v242_v23 = vld [vmem:[%s2267_s13 + $0x70] sm:$0xff] }
  0x13   : > { %1897 = vmatpush3.msra.mxu0 %v251_v4  ;;  %v243_v24 = vld [vmem:[%s2267_s13 + $0x78] sm:$0xff]  ;;  %v244_v25 = vld [vmem:[%s2267_s13 + $0x80] sm:$0xff]  ;;  %v245_v26 = vld [vmem:[%s2267_s13 + $0x88] sm:$0xff] }
  0x14   : > { %1898 = vmatprep.subr.mxu0 %v2186_v1  ;;  %v246_v27 = vld [vmem:[%s2267_s13 + $0x90] sm:$0xff]  ;;  %v767_v28 = vld [vmem:[%s3092_s3 + $0x8] sm:$0x3f]  ;;  %v766_v29 = vld [vmem:[%s3092_s3] sm:$0xff] }
  0x15   : > { %1899 = vmatpush3.msra.mxu0 %v250_v5  ;;  %2085 = vmatpush3.msk.msra.mxu1 %vm826_vm2, %v767_v28  ;;  %v2363_v30 = vld [vmem:[%s3091_s2] ss:$0 sm:$0xff] }
  0x16   : > { %1900 = vmatprep.subr.mxu0 %v2186_v1  ;;  %2084 = vmatprep.subr.mxu1 %v2186_v1 }
  0x17   : > { %1901 = vmatpush3.msra.mxu0 %v249_v6  ;;  %2086 = vmatpush3.msra.mxu1 %v766_v29 }
  0x18   : > { %1902 = vmatprep.subr.mxu0 %v2186_v1  ;;  %2024 = vmatprep.subr.mxu1 %v2186_v1 }
  0x19   : > { %1903 = vmatpush3.msra.mxu0 %v248_v7 }
  0x1a   : > { %1904 = vmatprep.subr.mxu0 %v2186_v1 }
  0x1b   : > { %1905 = vmatpush3.msra.mxu0 %v247_v8 }
  0x1c   : > { %1907 = vmatmul.mubr.msk.f32.vlgmr.msra.gmra.mxu0 %vm262_vm1, %v228_v9  ;;  %1963 = vmatprep.subr.mxu0 %v2186_v1 }
  0x1d   : > { %1909 = vmatprep.mubr.msk.f32.mxu0 %vm2187_vm0, %v2186_v1  ;;  %1964 = vmatpush3.msk.msra.mxu0 %vm826_vm2, %v767_v28 }
  0x1e   : > { %1965 = vmatprep.subr.mxu0 %v2186_v1 }
  0x1f   : > { %1966 = vmatpush3.msra.mxu0 %v766_v29 }
  0x20   : > { %1910 = vmatmul.mubr.msk.f32.gmra.mxu0 %vm262_vm1, %v229_v10 }
  0x21   : > { %1912 = vmatprep.mubr.msk.f32.mxu0 %vm2187_vm0, %v2186_v1 }
  0x24   : > { %1913 = vmatmul.mubr.msk.f32.gmra.mxu0 %vm262_vm1, %v230_v11 }
  0x25   : > { %1915 = vmatprep.mubr.msk.f32.mxu0 %vm2187_vm0, %v2186_v1 }
  0x28   : > { %1916 = vmatmul.mubr.msk.f32.gmra.mxu0 %vm262_vm1, %v231_v12 }
  0x29   : > { %1918 = vmatprep.mubr.msk.f32.mxu0 %vm2187_vm0, %v2186_v1 }
  0x2c   : > { %1919 = vmatmul.mubr.msk.f32.gmra.mxu0 %vm262_vm1, %v232_v13 }
  0x2d   : > { %1921 = vmatprep.mubr.msk.f32.mxu0 %vm2187_vm0, %v2186_v1 }
  0x30   : > { %1922 = vmatmul.mubr.msk.f32.gmra.mxu0 %vm262_vm1, %v233_v14 }
  0x31   : > { %1924 = vmatprep.mubr.msk.f32.mxu0 %vm2187_vm0, %v2186_v1 }
  0x34   : > { %1925 = vmatmul.mubr.msk.f32.gmra.mxu0 %vm262_vm1, %v234_v15 }
  0x35   : > { %1927 = vmatprep.mubr.msk.f32.mxu0 %vm2187_vm0, %v2186_v1 }
  0x38   : > { %1928 = vmatmul.mubr.msk.f32.gmra.mxu0 %vm262_vm1, %v235_v16 }
  0x39   : > { %1930 = vmatprep.mubr.msk.f32.mxu0 %vm2187_vm0, %v2186_v1 }
  0x3c   : > { %1931 = vmatmul.mubr.msk.f32.gmra.mxu0 %vm262_vm1, %v236_v17 }
  0x3d   : > { %1933 = vmatprep.mubr.msk.f32.mxu0 %vm2187_vm0, %v2186_v1 }
  0x40   : > { %1934 = vmatmul.mubr.msk.f32.gmra.mxu0 %vm262_vm1, %v237_v18 }
  0x41   : > { %1936 = vmatprep.mubr.msk.f32.mxu0 %vm2187_vm0, %v2186_v1 }
  0x44   : > { %1937 = vmatmul.mubr.msk.f32.gmra.mxu0 %vm262_vm1, %v238_v19 }
  0x45   : > { %1939 = vmatprep.mubr.msk.f32.mxu0 %vm2187_vm0, %v2186_v1 }
  0x48   : > { %1940 = vmatmul.mubr.msk.f32.gmra.mxu0 %vm262_vm1, %v239_v20 }
  0x49   : > { %1942 = vmatprep.mubr.msk.f32.mxu0 %vm2187_vm0, %v2186_v1 }
  0x4c   : > { %1943 = vmatmul.mubr.msk.f32.gmra.mxu0 %vm262_vm1, %v240_v21 }
  0x4d   : > { %1945 = vmatprep.mubr.msk.f32.mxu0 %vm2187_vm0, %v2186_v1 }
  0x50   : > { %1946 = vmatmul.mubr.msk.f32.gmra.mxu0 %vm262_vm1, %v241_v22 }
  0x51   : > { %1948 = vmatprep.mubr.msk.f32.mxu0 %vm2187_vm0, %v2186_v1 }
  0x54   : > { %1949 = vmatmul.mubr.msk.f32.gmra.mxu0 %vm262_vm1, %v242_v23 }
  0x55   : > { %1951 = vmatprep.mubr.msk.f32.mxu0 %vm2187_vm0, %v2186_v1 }
  0x58   : > { %1952 = vmatmul.mubr.msk.f32.gmra.mxu0 %vm262_vm1, %v243_v24 }
  0x59   : > { %1954 = vmatprep.mubr.msk.f32.mxu0 %vm2187_vm0, %v2186_v1 }
  0x5c   : > { %1955 = vmatmul.mubr.msk.f32.gmra.mxu0 %vm262_vm1, %v244_v25 }
  0x5d   : > { %1957 = vmatprep.mubr.msk.f32.mxu0 %vm2187_vm0, %v2186_v1 }
  0x60   : > { %1958 = vmatmul.mubr.msk.f32.gmra.mxu0 %vm262_vm1, %v245_v26 }
  0x61   : > { %1960 = vmatprep.mubr.msk.f32.mxu0 %vm2187_vm0, %v2186_v1 }
  0x64   : > { %1961 = vmatmul.mubr.msk.f32.gmra.mxu0 %vm262_vm1, %v246_v27 }
  0x65   : > { %1967 = vmatprep.mubr.msk.f32.mxu0 %vm2187_vm0, %v2186_v1 }
  0xdc   : > { %v386_v31 = vpop.f32.mrf.mxu0 }
  0xdd   : > { %v2366_v32 = vadd.f32 %v2363_v30, %v386_v31 }
  0xde   : > { %v1908_v33 = vpop.f32.mrf.mxu0 }
  0xdf   : > { %v651_v34 = vsub.f32 0.0, %v2366_v32 }
  0xe0   : > { %v391_v35 = vpop.f32.mrf.mxu0 }
  0xe1   : > { %v2370_v36 = vadd.f32 %v2363_v30, %v391_v35  ;;  %689 = vrot.lane.b32.xlu0 %v651_v34, %s2188_s24 }
  0xe2   : > { %v1911_v37 = vpop.f32.mrf.mxu0 }
  0xe3   : > { %v652_v38 = vsub.f32 0.0, %v2370_v36  ;;  %v499_v37 = vand.u32 2147483647, %v2366_v32 }
  0xe4   : > { %v396_v39 = vpop.f32.mrf.mxu0 }
  0xe5   : > { %v2375_v40 = vadd.f32 %v2363_v30, %v396_v39  ;;  %691 = vrot.lane.b32.xlu0 %v652_v38, %s2188_s24 }
  0xe6   : > { %v1914_v41 = vpop.f32.mrf.mxu0 }
  0xe7   : > { %v653_v42 = vsub.f32 0.0, %v2375_v40 }
  0xe8   : > { %v401_v43 = vpop.f32.mrf.mxu0 }
  0xe9   : > { %v2380_v44 = vadd.f32 %v2363_v30, %v401_v43  ;;  %693 = vrot.lane.b32.xlu1 %v653_v42, %s2188_s24  ;;  %v518_v43 = vsub.f32 0.0, %v499_v37 }
  0xea   : > { %v1917_v45 = vpop.f32.mrf.mxu0 }
  0xeb   : > { %v654_v46 = vsub.f32 0.0, %v2380_v44  ;;  %v500_v45 = vand.u32 2147483647, %v2370_v36 }
  0xec   : > { %v406_v47 = vpop.f32.mrf.mxu0 }
  0xed   : > { %v2385_v48 = vadd.f32 %v2363_v30, %v406_v47  ;;  %695 = vrot.lane.b32.xlu1 %v654_v46, %s2188_s24 }
  0xee   : > { %v1920_v49 = vpop.f32.mrf.mxu0 }
  0xef   : > { %v655_v50 = vsub.f32 0.0, %v2385_v48 }
  0xf0   : > { %v411_v51 = vpop.f32.mrf.mxu0 }
  0xf1   : > { %v2390_v52 = vadd.f32 %v2363_v30, %v411_v51  ;;  %697 = vrot.lane.b32.xlu0 %v655_v50, %s2188_s24  ;;  %v537_v51 = vmul.f32 1.442695, %v518_v43 }
  0xf2   : > { %v1923_v53 = vpop.f32.mrf.mxu0 }
  0xf3   : > { %v656_v55 = vsub.f32 0.0, %v2390_v52  ;;  %v519_v53 = vsub.f32 0.0, %v500_v45  ;;  %2098 = vpow2.f32 %v537_v51 }
  0xf4   : > { %v416_v54 = vpop.f32.mrf.mxu0 }
  0xf5   : > { %v2395_v56 = vadd.f32 %v2363_v30, %v416_v54  ;;  %699 = vrot.lane.b32.xlu1 %v656_v55, %s2188_s24  ;;  %v501_v54 = vand.u32 2147483647, %v2375_v40 }
  0xf6   : > { %v1926_v57 = vpop.f32.mrf.mxu0 }
  0xf7   : > { %v657_v59 = vsub.f32 0.0, %v2395_v56 }
  0xf8   : > { %v421_v58 = vpop.f32.mrf.mxu0 }
  0xf9   : > { %v2400_v60 = vadd.f32 %v2363_v30, %v421_v58  ;;  %701 = vrot.lane.b32.xlu0 %v657_v59, %s2188_s24  ;;  %v502_v58 = vand.u32 2147483647, %v2380_v44  ;;  %v539_v59 = vmul.f32 1.442695, %v519_v53 }
  0xfa   : > { %v1929_v61 = vpop.f32.mrf.mxu0 }
  0xfb   : > { %v658_v63 = vsub.f32 0.0, %v2400_v60  ;;  %v520_v61 = vsub.f32 0.0, %v501_v54  ;;  %2100 = vpow2.f32 %v539_v59 }
  0xfc   : > { %v426_v62 = vpop.f32.mrf.mxu0 }
  0xfd   : > { %v2405_v0 = vadd.f32 %v2363_v30, %v426_v62  ;;  %703 = vrot.lane.b32.xlu1 %v658_v63, %s2188_s24  ;;  %v521_v62 = vsub.f32 0.0, %v502_v58  ;;  %v541_v63 = vmul.f32 1.442695, %v520_v61  ;;  %v480_v61 = vmin.f32 %v2366_v32, 0.0 }
  0xfe   : > { %v1932_v2 = vpop.f32.mrf.mxu0 }
  0xff   : > { %v659_v4 = vsub.f32 0.0, %v2405_v0  ;;  %v543_v2 = vmul.f32 1.442695, %v521_v62  ;;  %2102 = vpow2.f32 %v541_v63 }
 0x100   : > { %v431_v3 = vpop.f32.mrf.mxu0 }
 0x101   : > { %v2410_v5 = vadd.f32 %v2363_v30, %v431_v3  ;;  %705 = vrot.lane.b32.xlu0 %v659_v4, %s2188_s24  ;;  %v504_v4 = vand.u32 2147483647, %v2390_v52  ;;  %2104 = vpow2.f32 %v543_v2 }
 0x102   : > { %v1935_v6 = vpop.f32.mrf.mxu0 }
 0x103   : > { %v660_v7 = vsub.f32 0.0, %v2410_v5 }
 0x104   : > { %v436_v8 = vpop.f32.mrf.mxu0 }
 0x105   : > { %v2415_v9 = vadd.f32 %v2363_v30, %v436_v8  ;;  %707 = vrot.lane.b32.xlu1 %v660_v7, %s2188_s24  ;;  %v2099_v7 = vpop.eup %2098  ;;  %v523_v8 = vsub.f32 0.0, %v504_v4 }
 0x106   : > { %v1938_v10 = vpop.f32.mrf.mxu0 }
 0x107   : > { %v661_v11 = vsub.f32 0.0, %v2415_v9  ;;  %v505_v10 = vand.u32 2147483647, %v2395_v56 }
 0x108   : > { %v441_v12 = vpop.f32.mrf.mxu0 }
 0x109   : > { %v2420_v13 = vadd.f32 %v2363_v30, %v441_v12  ;;  %709 = vrot.lane.b32.xlu0 %v661_v11, %s2188_s24  ;;  %v575_v11 = vadd.f32 1.0, %v2099_v7  ;;  %v2101_v12 = vpop.eup %2100 }
 0x10a   : > { %v1941_v14 = vpop.f32.mrf.mxu0 }
 0x10b   : > { %v662_v15 = vsub.f32 0.0, %v2420_v13  ;;  %v547_v14 = vmul.f32 1.442695, %v523_v8 }
 0x10c   : > { %v446_v16 = vpop.f32.mrf.mxu0 }
 0x10d   : > { %v2425_v17 = vadd.f32 %v2363_v30, %v446_v16  ;;  %711 = vrot.lane.b32.xlu1 %v662_v15, %s2188_s24  ;;  %v524_v15 = vsub.f32 0.0, %v505_v10  ;;  %v506_v16 = vand.u32 2147483647, %v2400_v60  ;;  %v481_v10 = vmin.f32 %v2370_v36, 0.0 }
 0x10e   : > { %v1944_v18 = vpop.f32.mrf.mxu0  ;;  %v482_v36 = vmin.f32 %v2375_v40, 0.0  ;;  %v483_v40 = vmin.f32 %v2380_v44, 0.0  ;;  %v484_v44 = vmin.f32 %v2385_v48, 0.0 }
 0x10f   : > { %v663_v19 = vsub.f32 0.0, %v2425_v17  ;;  %v576_v18 = vadd.f32 1.0, %v2101_v12  ;;  %v511_v51 = vand.u32 2147483647, %v2425_v17 }
 0x110   : > { %v451_v20 = vpop.f32.mrf.mxu0 }
 0x111   : > { %v2430_v21 = vadd.f32 %v2363_v30, %v451_v20  ;;  %713 = vrot.lane.b32.xlu0 %v663_v19, %s2188_s24  ;;  %v507_v19 = vand.u32 2147483647, %v2405_v0  ;;  %v2103_v20 = vpop.eup %2102  ;;  %v530_v62 = vsub.f32 0.0, %v511_v51 }
 0x112   : > { %v1947_v22 = vpop.f32.mrf.mxu0 }
 0x113   : > { %v664_v24 = vsub.f32 0.0, %v2430_v21  ;;  %v549_v22 = vmul.f32 1.442695, %v524_v15  ;;  %v561_v12 = vmul.f32 1.442695, %v530_v62 }
 0x114   : > { %v456_v23 = vpop.f32.mrf.mxu0 }
 0x115   : > { %v2435_v25 = vadd.f32 %v2363_v30, %v456_v23  ;;  %715 = vrot.lane.b32.xlu1 %v664_v24, %s2188_s24  ;;  %v525_v23 = vsub.f32 0.0, %v506_v16  ;;  %v2105_v24 = vpop.eup %2104 }
 0x116   : > { %v1950_v26 = vpop.f32.mrf.mxu0 }
 0x117   : > { %v665_v28 = vsub.f32 0.0, %v2435_v25  ;;  %v577_v26 = vadd.f32 1.0, %v2103_v20  ;;  %v513_v20 = vand.u32 2147483647, %v2435_v25 }
 0x118   : > { %v461_v27 = vpop.f32.mrf.mxu0 }
 0x119   : > { %v2440_v29 = vadd.f32 %v2363_v30, %v461_v27  ;;  %717 = vrot.lane.b32.xlu0 %v665_v28, %s2188_s24  ;;  %v526_v27 = vsub.f32 0.0, %v507_v19  ;;  %v508_v28 = vand.u32 2147483647, %v2410_v5 }
 0x11a   : > { %v1953_v31 = vpop.f32.mrf.mxu0 }
 0x11b   : > { %v666_v34 = vsub.f32 0.0, %v2440_v29  ;;  %v551_v31 = vmul.f32 1.442695, %v525_v23  ;;  %v553_v37 = vmul.f32 1.442695, %v526_v27 }
 0x11c   : > { %v466_v33 = vpop.f32.mrf.mxu0 }
 0x11d   : > { %v2445_v35 = vadd.f32 %v2363_v30, %v466_v33  ;;  %719 = vrot.lane.b32.xlu1 %v666_v34, %s2188_s24  ;;  %v578_v33 = vadd.f32 1.0, %v2105_v24 }
 0x11e   : > { %v1956_v38 = vpop.f32.mrf.mxu0 }
 0x11f   : > { %v667_v41 = vsub.f32 0.0, %v2445_v35  ;;  %v527_v38 = vsub.f32 0.0, %v508_v28  ;;  %v515_v51 = vand.u32 2147483647, %v2445_v35 }
 0x120   : > { %v471_v39 = vpop.f32.mrf.mxu0 }
 0x121   : > { %v2451_v42 = vadd.f32 %v2363_v30, %v471_v39  ;;  %721 = vrot.lane.b32.xlu0 %v667_v41, %s2188_s24  ;;  %v509_v39 = vand.u32 2147483647, %v2415_v9  ;;  %v555_v43 = vmul.f32 1.442695, %v527_v38 }
 0x122   : > { %v1959_v46 = vpop.f32.mrf.mxu0 }
 0x123   : > { %v668_v47 = vsub.f32 0.0, %v2451_v42  ;;  %v528_v45 = vsub.f32 0.0, %v509_v39  ;;  %v510_v46 = vand.u32 2147483647, %v2420_v13 }
 0x124   : > { %v476_v49 = vpop.f32.mrf.mxu0 }
 0x125   : > { %v2457_v50 = vadd.f32 %v2363_v30, %v476_v49  ;;  %723 = vrot.lane.b32.xlu1 %v668_v47, %s2188_s24  ;;  %v503_v30 = vand.u32 2147483647, %v2385_v48  ;;  %v557_v53 = vmul.f32 1.442695, %v528_v45  ;;  %v529_v54 = vsub.f32 0.0, %v510_v46 }
 0x126   : > { %v1962_v55 = vpop.f32.mrf.mxu0 }
 0x127   : > { %v669_v57 = vsub.f32 0.0, %v2457_v50  ;;  %v522_v3 = vsub.f32 0.0, %v503_v30  ;;  %v559_v30 = vmul.f32 1.442695, %v529_v54 }
 0x129   : > { %725 = vrot.lane.b32.xlu0 %v669_v57, %s2188_s24  ;;  %v545_v6 = vmul.f32 1.442695, %v522_v3 }
 0x12b   : > { %2106 = vpow2.f32 %v545_v6  ;;  %v512_v6 = vand.u32 2147483647, %v2430_v21 }
 0x12c   : > { %2108 = vlog2.f32 %v575_v11 }
 0x12d   : > { %2110 = vpow2.f32 %v547_v14  ;;  %v531_v19 = vsub.f32 0.0, %v512_v6 }
 0x12e   : > { %2112 = vlog2.f32 %v576_v18 }
 0x12f   : > { %2114 = vpow2.f32 %v549_v22 }
 0x130   : > { %2116 = vlog2.f32 %v577_v26 }
 0x131   : > { %2118 = vpow2.f32 %v551_v31 }
 0x132   : > { %2120 = vlog2.f32 %v578_v33  ;;  %v563_v33 = vmul.f32 1.442695, %v531_v19 }
 0x133   : > { %2122 = vpow2.f32 %v553_v37  ;;  %v514_v37 = vand.u32 2147483647, %v2440_v29 }
 0x138   : > { %v2107_v34 = vpop.eup %2106 }
 0x139   : > { %v579_v41 = vadd.f32 1.0, %v2107_v34  ;;  %v2109_v47 = vpop.eup %2108  ;;  %v532_v34 = vsub.f32 0.0, %v513_v20 }
 0x13a   : > { %v2111_v49 = vpop.eup %2110  ;;  %v595_v55 = vmul.f32 0.6931472, %v2109_v47 }
 0x13b   : > { %2124 = vlog2.f32 %v579_v41  ;;  %v2113_v57 = vpop.eup %2112  ;;  %v580_v58 = vadd.f32 1.0, %v2111_v49  ;;  %v565_v47 = vmul.f32 1.442695, %v532_v34  ;;  %v533_v49 = vsub.f32 0.0, %v514_v37 }
 0x13c   : > { %2126 = vpow2.f32 %v555_v43  ;;  %v2115_v59 = vpop.eup %2114  ;;  %v632_v63 = vsub.f32 %v480_v61, %v595_v55  ;;  %v597_v2 = vmul.f32 0.6931472, %v2113_v57 }
 0x13d   : > { %2128 = vpow2.f32 %v557_v53  ;;  %v2117_v3 = vpop.eup %2116  ;;  %v581_v4 = vadd.f32 1.0, %v2115_v59  ;;  %v567_v62 = vmul.f32 1.442695, %v533_v49  ;;  %v489_v49 = vmin.f32 %v2410_v5, 0.0 }
 0x13e   : > { %2130 = vlog2.f32 %v580_v58  ;;  %v2119_v8 = vpop.eup %2118  ;;  %v633_v14 = vsub.f32 %v481_v10, %v597_v2  ;;  %v599_v15 = vmul.f32 0.6931472, %v2117_v3  ;;  %v516_v58 = vand.u32 2147483647, %v2451_v42 }
 0x13f   : > { %v2121_v32 = vpop.eup %2120  ;;  %2132 = vpow2.f32 %v559_v30  ;;  %v582_v18 = vadd.f32 1.0, %v2119_v8  ;;  %v534_v30 = vsub.f32 0.0, %v515_v51  ;;  %v517_v10 = vand.u32 2147483647, %v2457_v50 }
 0x140   : > { %v2123_v16 = vpop.eup %2122  ;;  %2134 = vlog2.f32 %v581_v4  ;;  %v634_v27 = vsub.f32 %v482_v36, %v599_v15  ;;  %v601_v28 = vmul.f32 0.6931472, %v2121_v32  ;;  %v485_v4 = vmin.f32 %v2390_v52, 0.0 }
 0x141   : > { %2136 = vpow2.f32 %v561_v12  ;;  %v583_v26 = vadd.f32 1.0, %v2123_v16  ;;  %v535_v8 = vsub.f32 0.0, %v516_v58  ;;  %v486_v16 = vmin.f32 %v2395_v56, 0.0 }
 0x142   : > { %2138 = vlog2.f32 %v582_v18  ;;  %v635_v43 = vsub.f32 %v483_v40, %v601_v28  ;;  %v536_v20 = vsub.f32 0.0, %v517_v10 }
 0x143   : > { %2140 = vlog2.f32 %v583_v26  ;;  %v571_v19 = vmul.f32 1.442695, %v535_v8 }
 0x144   : > { %2142 = vpow2.f32 %v563_v33  ;;  %v573_v28 = vmul.f32 1.442695, %v536_v20 }
 0x148   : > { %v2125_v24 = vpop.eup %2124 }
 0x149   : > { %v2127_v31 = vpop.eup %2126  ;;  %v603_v45 = vmul.f32 0.6931472, %v2125_v24 }
 0x14a   : > { %v584_v41 = vadd.f32 1.0, %v2127_v31  ;;  %v2129_v46 = vpop.eup %2128 }
 0x14b   : > { %v2131_v54 = vpop.eup %2130  ;;  %v585_v57 = vadd.f32 1.0, %v2129_v46  ;;  %v636_v59 = vsub.f32 %v484_v44, %v603_v45 }
 0x14c   : > { %2144 = vlog2.f32 %v584_v41  ;;  %v2133_v61 = vpop.eup %2132  ;;  %v605_v2 = vmul.f32 0.6931472, %v2131_v54 }
 0x14d   : > { %2146 = vpow2.f32 %v565_v47  ;;  %v2135_v3 = vpop.eup %2134 }
 0x14e   : > { %v2137_v6 = vpop.eup %2136  ;;  %2148 = vlog2.f32 %v585_v57  ;;  %v637_v12 = vsub.f32 %v485_v4, %v605_v2  ;;  %v607_v32 = vmul.f32 0.6931472, %v2135_v3 }
 0x14f   : > { %2150 = vpow2.f32 %v567_v62  ;;  %v587_v52 = vadd.f32 1.0, %v2137_v6 }
 0x150   : > { %v638_v36 = vsub.f32 %v486_v16, %v607_v32 }
 0x153   : > { %v690_v7 = vpop.permute.xlu0 %689 }
 0x154   : > { %v747_v11 = vsel %vm746_vm3, %v632_v63, %v690_v7  ;;  %v586_v7 = vadd.f32 1.0, %v2133_v61 }
 0x155   : > { %1968 = vmatmul.mubr.msk.f32.vlgmr.msra.gmra.mxu0 %vm768_vm4, %v747_v11  ;;  %v569_v11 = vmul.f32 1.442695, %v534_v30 }
 0x156   : > { %1970 = vmatprep.mubr.msk.f32.mxu0 %vm2187_vm0, %v2186_v1  ;;  %2152 = vlog2.f32 %v586_v7 }
 0x157   : > { %v692_v22 = vpop.permute.xlu0 %691  ;;  %2154 = vpow2.f32 %v569_v11 }
 0x158   : > { %v748_v23 = vsel %vm746_vm3, %v633_v14, %v692_v22  ;;  %v2139_v14 = vpop.eup %2138  ;;  %2156 = vlog2.f32 %v587_v52 }
 0x159   : > { %1971 = vmatmul.mubr.msk.f32.gmra.mxu0 %vm768_vm4, %v748_v23  ;;  %v2141_v22 = vpop.eup %2140  ;;  %v609_v23 = vmul.f32 0.6931472, %v2139_v14  ;;  %2158 = vpow2.f32 %v571_v19  ;;  %v493_v19 = vmin.f32 %v2430_v21, 0.0 }
 0x15a   : > { %1973 = vmatprep.mubr.msk.f32.mxu0 %vm2187_vm0, %v2186_v1  ;;  %v2143_v24 = vpop.eup %2142  ;;  %v611_v37 = vmul.f32 0.6931472, %v2141_v22  ;;  %2160 = vpow2.f32 %v573_v28  ;;  %v495_v28 = vmin.f32 %v2440_v29, 0.0 }
 0x15b   : > { %v694_v38 = vpop.permute.xlu1 %693  ;;  %v2145_v31 = vpop.eup %2144  ;;  %v588_v33 = vadd.f32 1.0, %v2143_v24 }
 0x15c   : > { %v749_v39 = vsel %vm746_vm3, %v634_v27, %v694_v38  ;;  %v487_v27 = vmin.f32 %v2400_v60, 0.0  ;;  %v2147_v38 = vpop.eup %2146  ;;  %v613_v41 = vmul.f32 0.6931472, %v2145_v31 }
 0x15d   : > { %1974 = vmatmul.mubr.msk.f32.gmra.mxu0 %vm768_vm4, %v749_v39  ;;  %v488_v39 = vmin.f32 %v2405_v0, 0.0  ;;  %2162 = vlog2.f32 %v588_v33  ;;  %v589_v45 = vadd.f32 1.0, %v2147_v38  ;;  %v496_v38 = vmin.f32 %v2445_v35, 0.0 }
 0x15e   : > { %1976 = vmatprep.mubr.msk.f32.mxu0 %vm2187_vm0, %v2186_v1  ;;  %v639_v34 = vsub.f32 %v487_v27, %v609_v23  ;;  %v641_v54 = vsub.f32 %v489_v49, %v613_v41  ;;  %v494_v23 = vmin.f32 %v2435_v25, 0.0  ;;  %v497_v41 = vmin.f32 %v2451_v42, 0.0 }
 0x15f   : > { %v696_v53 = vpop.permute.xlu1 %695  ;;  %v640_v46 = vsub.f32 %v488_v39, %v611_v37  ;;  %2164 = vlog2.f32 %v589_v45  ;;  %v498_v49 = vmin.f32 %v2457_v50, 0.0 }
 0x160   : > { %v750_v55 = vsel %vm746_vm3, %v635_v43, %v696_v53  ;;  %v2149_v43 = vpop.eup %2148 }
 0x161   : > { %1977 = vmatmul.mubr.msk.f32.gmra.mxu0 %vm768_vm4, %v750_v55  ;;  %v2151_v47 = vpop.eup %2150  ;;  %v615_v0 = vmul.f32 0.6931472, %v2149_v43 }
 0x162   : > { %1979 = vmatprep.mubr.msk.f32.mxu0 %vm2187_vm0, %v2186_v1  ;;  %v590_v55 = vadd.f32 1.0, %v2151_v47 }
 0x163   : > { %v698_v63 = vpop.permute.xlu0 %697  ;;  %v2153_v44 = vpop.eup %2152 }
 0x164   : > { %v751_v48 = vsel %vm746_vm3, %v636_v59, %v698_v63  ;;  %v2155_v58 = vpop.eup %2154  ;;  %v490_v59 = vmin.f32 %v2415_v9, 0.0  ;;  %v617_v30 = vmul.f32 0.6931472, %v2153_v44  ;;  %2166 = vlog2.f32 %v590_v55 }
 0x165   : > { %1980 = vmatmul.mubr.msk.f32.gmra.mxu0 %vm768_vm4, %v751_v48  ;;  %v2157_v5 = vpop.eup %2156  ;;  %v591_v2 = vadd.f32 1.0, %v2155_v58  ;;  %v491_v48 = vmin.f32 %v2420_v13, 0.0 }
 0x166   : > { %1982 = vmatprep.mubr.msk.f32.mxu0 %vm2187_vm0, %v2186_v1  ;;  %v642_v62 = vsub.f32 %v490_v59, %v615_v0  ;;  %v2159_v63 = vpop.eup %2158  ;;  %v619_v7 = vmul.f32 0.6931472, %v2157_v5 }
 0x167   : > { %v700_v15 = vpop.permute.xlu1 %699  ;;  %v592_v6 = vadd.f32 1.0, %v2159_v63  ;;  %v643_v9 = vsub.f32 %v491_v48, %v617_v30  ;;  %v2161_v8 = vpop.eup %2160  ;;  %2168 = vlog2.f32 %v591_v2 }
 0x168   : > { %v752_v18 = vsel %vm746_vm3, %v637_v12, %v700_v15  ;;  %v492_v12 = vmin.f32 %v2425_v17, 0.0  ;;  %v593_v13 = vadd.f32 1.0, %v2161_v8 }
 0x169   : > { %1983 = vmatmul.mubr.msk.f32.gmra.mxu0 %vm768_vm4, %v752_v18  ;;  %2170 = vlog2.f32 %v592_v6 }
 0x16a   : > { %1985 = vmatprep.mubr.msk.f32.mxu0 %vm2187_vm0, %v2186_v1  ;;  %v2163_v11 = vpop.eup %2162  ;;  %v644_v14 = vsub.f32 %v492_v12, %v619_v7  ;;  %2172 = vlog2.f32 %v593_v13 }
 0x16b   : > { %v702_v26 = vpop.permute.xlu0 %701  ;;  %v621_v16 = vmul.f32 0.6931472, %v2163_v11 }
 0x16c   : > { %v753_v56 = vsel %vm746_vm3, %v638_v36, %v702_v26  ;;  %v2165_v52 = vpop.eup %2164 }
 0x16d   : > { %1986 = vmatmul.mubr.msk.f32.gmra.mxu0 %vm768_vm4, %v753_v56  ;;  %v645_v17 = vsub.f32 %v493_v19, %v621_v16  ;;  %v623_v20 = vmul.f32 0.6931472, %v2165_v52 }
 0x16e   : > { %1988 = vmatprep.mubr.msk.f32.mxu0 %vm2187_vm0, %v2186_v1 }
 0x16f   : > { %v704_v40 = vpop.permute.xlu1 %703  ;;  %v646_v26 = vsub.f32 %v494_v23, %v623_v20 }
 0x170   : > { %v754_v60 = vsel %vm746_vm3, %v639_v34, %v704_v40 }
 0x171   : > { %1989 = vmatmul.mubr.msk.f32.gmra.mxu0 %vm768_vm4, %v754_v60  ;;  %v2167_v22 = vpop.eup %2166 }
 0x172   : > { %v625_v21 = vmul.f32 0.6931472, %v2167_v22 }
 0x173   : > { %v706_v51 = vpop.permute.xlu0 %705 }
 0x174   : > { %v755_v53 = vsel %vm746_vm3, %v640_v46, %v706_v51  ;;  %v2169_v27 = vpop.eup %2168  ;;  %v647_v34 = vsub.f32 %v495_v28, %v625_v21 }
 0x175   : > { %1992 = vmatmul.mubr.msk.f32.vlgmr.msra.gmra.mxu1 %vm768_vm4, %v755_v53  ;;  %v627_v25 = vmul.f32 0.6931472, %v2169_v27 }
 0x176   : > { %1994 = vmatprep.mubr.msk.f32.mxu1 %vm2187_vm0, %v2186_v1  ;;  %v2171_v33 = vpop.eup %2170 }
 0x177   : > { %v708_v57 = vpop.permute.xlu1 %707  ;;  %v629_v39 = vmul.f32 0.6931472, %v2171_v33  ;;  %v2173_v60 = vpop.eup %2172  ;;  %v648_v29 = vsub.f32 %v496_v38, %v627_v25 }
 0x178   : > { %v756_v61 = vsel %vm746_vm3, %v641_v54, %v708_v57  ;;  %v631_v47 = vmul.f32 0.6931472, %v2173_v60 }
 0x179   : > { %1995 = vmatmul.mubr.msk.f32.gmra.mxu1 %vm768_vm4, %v756_v61  ;;  %v649_v46 = vsub.f32 %v497_v41, %v629_v39 }
 0x17a   : > { %1997 = vmatprep.mubr.msk.f32.mxu1 %vm2187_vm0, %v2186_v1  ;;  %v650_v53 = vsub.f32 %v498_v49, %v631_v47 }
 0x17b   : > { %v710_v3 = vpop.permute.xlu0 %709 }
 0x17c   : > { %v757_v4 = vsel %vm746_vm3, %v642_v62, %v710_v3 }
 0x17d   : > { %1998 = vmatmul.mubr.msk.f32.gmra.mxu1 %vm768_vm4, %v757_v4 }
 0x17e   : > { %2000 = vmatprep.mubr.msk.f32.mxu1 %vm2187_vm0, %v2186_v1 }
 0x17f   : > { %v712_v10 = vpop.permute.xlu1 %711 }
 0x180   : > { %v758_v32 = vsel %vm746_vm3, %v643_v9, %v712_v10 }
 0x181   : > { %2001 = vmatmul.mubr.msk.f32.gmra.mxu1 %vm768_vm4, %v758_v32 }
 0x182   : > { %2003 = vmatprep.mubr.msk.f32.mxu1 %vm2187_vm0, %v2186_v1 }
 0x183   : > { %v714_v15 = vpop.permute.xlu0 %713 }
 0x184   : > { %v759_v18 = vsel %vm746_vm3, %v644_v14, %v714_v15 }
 0x185   : > { %2004 = vmatmul.mubr.msk.f32.gmra.mxu1 %vm768_vm4, %v759_v18 }
 0x186   : > { %2006 = vmatprep.mubr.msk.f32.mxu1 %vm2187_vm0, %v2186_v1 }
 0x187   : > { %v716_v36 = vpop.permute.xlu1 %715 }
 0x188   : > { %v760_v24 = vsel %vm746_vm3, %v645_v17, %v716_v36  ;;  %v2621_v36 = vld [vmem:[%s3093_s4] sm:$0xff] }
 0x189   : > { %2007 = vmatmul.mubr.msk.f32.gmra.mxu1 %vm768_vm4, %v760_v24 }
 0x18a   : > { %2009 = vmatprep.mubr.msk.f32.mxu1 %vm2187_vm0, %v2186_v1 }
 0x18b   : > { %v718_v56 = vpop.permute.xlu0 %717 }
 0x18c   : > { %v761_v31 = vsel %vm746_vm3, %v646_v26, %v718_v56  ;;  %v1432_v26 = vsel %vm1431_vm6, %v2621_v36, -inf }
 0x18d   : > { %2010 = vmatmul.mubr.msk.f32.gmra.mxu1 %vm768_vm4, %v761_v31 }
 0x18e   : > { %2012 = vmatprep.mubr.msk.f32.mxu1 %vm2187_vm0, %v2186_v1 }
 0x18f   : > { %v720_v37 = vpop.permute.xlu1 %719 }
 0x190   : > { %v762_v40 = vsel %vm746_vm3, %v647_v34, %v720_v37 }
 0x191   : > { %2013 = vmatmul.mubr.msk.f32.gmra.mxu1 %vm768_vm4, %v762_v40 }
 0x192   : > { %2015 = vmatprep.mubr.msk.f32.mxu1 %vm2187_vm0, %v2186_v1 }
 0x193   : > { %v722_v43 = vpop.permute.xlu0 %721 }
 0x194   : > { %v763_v45 = vsel %vm746_vm3, %v648_v29, %v722_v43 }
 0x195   : > { %2016 = vmatmul.mubr.msk.f32.gmra.mxu1 %vm768_vm4, %v763_v45 }
 0x196   : > { %2018 = vmatprep.mubr.msk.f32.mxu1 %vm2187_vm0, %v2186_v1 }
 0x197   : > { %v724_v35 = vpop.permute.xlu1 %723 }
 0x198   : > { %v764_v51 = vsel %vm746_vm3, %v649_v46, %v724_v35 }
 0x199   : > { %2019 = vmatmul.mubr.msk.f32.gmra.mxu1 %vm768_vm4, %v764_v51  ;;  %v1048_v51 = vlaneseq }
 0x19a   : > { %2021 = vmatprep.mubr.msk.f32.mxu1 %vm2187_vm0, %v2186_v1 }
 0x19b   : > { %v726_v54 = vpop.permute.xlu0 %725 }
 0x19c   : > { %v765_v42 = vsel %vm746_vm3, %v650_v53, %v726_v54  ;;  %v2655_v53 = vand.u32 127, %v1048_v51 }
 0x19d   : > { %2022 = vmatmul.mubr.msk.f32.gmra.mxu1 %vm768_vm4, %v765_v42 }
 0x19e   : > { %2026 = vmatprep.mubr.msk.f32.mxu1 %vm2187_vm0, %v2186_v1 }
 0x215   : > { %v2572_v0 = vpop.f32.mrf.mxu0 }
 0x216   : > { %v991_v50 = vsel %vm990_vm5, %v2572_v0, -inf }
 0x217   : > { %992 = vmax.xlane.f32.xlu1 %v991_v50  ;;  %v1969_v44 = vpop.f32.mrf.mxu0 }
 0x219   : > { %v2576_v55 = vpop.f32.mrf.mxu0 }
 0x21a   : > { %v994_v57 = vsel %vm990_vm5, %v2576_v55, -inf }
 0x21b   : > { %995 = vmax.xlane.f32.xlu0 %v994_v57  ;;  %v1972_v58 = vpop.f32.mrf.mxu0 }
 0x21d   : > { %v2580_v59 = vpop.f32.mrf.mxu0 }
 0x21e   : > { %v997_v61 = vsel %vm990_vm5, %v2580_v59, -inf }
 0x21f   : > { %998 = vmax.xlane.f32.xlu0 %v997_v61  ;;  %v1975_v5 = vpop.f32.mrf.mxu0 }
 0x221   : > { %v2584_v62 = vpop.f32.mrf.mxu0 }
 0x222   : > { %v1000_v30 = vsel %vm990_vm5, %v2584_v62, -inf }
 0x223   : > { %1001 = vmax.xlane.f32.xlu1 %v1000_v30  ;;  %v1978_v63 = vpop.f32.mrf.mxu0 }
 0x225   : > { %v2588_v2 = vpop.f32.mrf.mxu0 }
 0x226   : > { %v1003_v3 = vsel %vm990_vm5, %v2588_v2, -inf }
 0x227   : > { %1004 = vmax.xlane.f32.xlu0 %v1003_v3  ;;  %v1981_v48 = vpop.f32.mrf.mxu0 }
 0x229   : > { %v2592_v4 = vpop.f32.mrf.mxu0 }
 0x22a   : > { %v1006_v6 = vsel %vm990_vm5, %v2592_v4, -inf }
 0x22b   : > { %1007 = vmax.xlane.f32.xlu1 %v1006_v6  ;;  %v1984_v9 = vpop.f32.mrf.mxu0 }
 0x22d   : > { %v2596_v7 = vpop.f32.mrf.mxu0 }
 0x22e   : > { %v1009_v8 = vsel %vm990_vm5, %v2596_v7, -inf }
 0x22f   : > { %1010 = vmax.xlane.f32.xlu0 %v1009_v8  ;;  %v1987_v10 = vpop.f32.mrf.mxu0 }
 0x231   : > { %v2600_v11 = vpop.f32.mrf.mxu0 }
 0x232   : > { %v1012_v12 = vsel %vm990_vm5, %v2600_v11, -inf }
 0x233   : > { %1013 = vmax.xlane.f32.xlu1 %v1012_v12  ;;  %v1990_v32 = vpop.f32.mrf.mxu0 }
 0x235   : > { %v2604_v13 = vpop.f32.mrf.mxu1 }
 0x236   : > { %v1015_v14 = vsel %vm990_vm5, %v2604_v13, -inf }
 0x237   : > { %v1993_v15 = vpop.f32.mrf.mxu1  ;;  %1016 = vmax.xlane.f32.xlu0 %v1015_v14 }
 0x239   : > { %v2608_v16 = vpop.f32.mrf.mxu1 }
 0x23a   : > { %v1018_v52 = vsel %vm990_vm5, %v2608_v16, -inf }
 0x23b   : > { %v1996_v18 = vpop.f32.mrf.mxu1  ;;  %1019 = vmax.xlane.f32.xlu1 %v1018_v52 }
 0x23d   : > { %v2612_v19 = vpop.f32.mrf.mxu1 }
 0x23e   : > { %v1021_v17 = vsel %vm990_vm5, %v2612_v19, -inf }
 0x23f   : > { %v1999_v20 = vpop.f32.mrf.mxu1  ;;  %1022 = vmax.xlane.f32.xlu0 %v1021_v17 }
 0x241   : > { %v2616_v22 = vpop.f32.mrf.mxu1 }
 0x242   : > { %v1024_v23 = vsel %vm990_vm5, %v2616_v22, -inf }
 0x243   : > { %v2002_v24 = vpop.f32.mrf.mxu1  ;;  %1025 = vmax.xlane.f32.xlu1 %v1024_v23 }
 0x245   : > { %v2627_v21 = vpop.f32.mrf.mxu1 }
 0x246   : > { %v1027_v27 = vsel %vm990_vm5, %v2627_v21, -inf }
 0x247   : > { %v2005_v56 = vpop.f32.mrf.mxu1  ;;  %1028 = vmax.xlane.f32.xlu0 %v1027_v27  ;;  %1433 = vmax.xlane.f32.xlu1 %v1432_v26 }
 0x249   : > { %v2631_v28 = vpop.f32.mrf.mxu1 }
 0x24a   : > { %v1030_v31 = vsel %vm990_vm5, %v2631_v28, -inf }
 0x24b   : > { %v2008_v33 = vpop.f32.mrf.mxu1  ;;  %1031 = vmax.xlane.f32.xlu0 %v1030_v31 }
 0x24d   : > { %v2635_v34 = vpop.f32.mrf.mxu1 }
 0x24e   : > { %v1033_v25 = vsel %vm990_vm5, %v2635_v34, -inf }
 0x24f   : > { %v2011_v37 = vpop.f32.mrf.mxu1  ;;  %1034 = vmax.xlane.f32.xlu1 %v1033_v25 }
 0x251   : > { %v2639_v38 = vpop.f32.mrf.mxu1 }
 0x252   : > { %v1036_v40 = vsel %vm990_vm5, %v2639_v38, -inf }
 0x253   : > { %v2014_v39 = vpop.f32.mrf.mxu1  ;;  %1037 = vmax.xlane.f32.xlu0 %v1036_v40 }
 0x255   : > { %v2643_v60 = vpop.f32.mrf.mxu1 }
 0x256   : > { %v1039_v29 = vsel %vm990_vm5, %v2643_v60, -inf }
 0x257   : > { %v2017_v41 = vpop.f32.mrf.mxu1  ;;  %1040 = vmax.xlane.f32.xlu1 %v1039_v29 }
 0x259   : > { %v2647_v43 = vpop.f32.mrf.mxu1 }
 0x25a   : > { %v1042_v45 = vsel %vm990_vm5, %v2647_v43, -inf }
 0x25b   : > { %v2020_v46 = vpop.f32.mrf.mxu1  ;;  %1043 = vmax.xlane.f32.xlu0 %v1042_v45 }
 0x25d   : > { %v2651_v47 = vpop.f32.mrf.mxu1 }
 0x25e   : > { %v1045_v35 = vsel %vm990_vm5, %v2651_v47, -inf }
 0x25f   : > { %v2023_v49 = vpop.f32.mrf.mxu1  ;;  %1046 = vmax.xlane.f32.xlu1 %v1045_v35 }
 0x2a0   : > { %v993_v54 = vpop.xlane.xlu1 %992 }
 0x2a1   : > { %vm1050_vm7 = vcmp.ge.f32.partialorder %v2572_v0, %v993_v54 }
 0x2a2   : > { %v1069_v42 = vsel %vm1050_vm7, %v2655_v53, 8 }
 0x2a3   : > { %v2660_v50 = vsel %vm990_vm5, %v1069_v42, 2147483647 }
 0x2a4   : > { %v996_v44 = vpop.xlane.xlu0 %995  ;;  %v1090_v57 = vshra.s32 %v2660_v50, 16 }
 0x2a5   : > { %vm1051_vm8 = vcmp.ge.f32.partialorder %v2576_v55, %v996_v44 }
 0x2a6   : > { %v1070_v58 = vsel %vm1051_vm8, %v2655_v53, 8  ;;  %v2665_v61 = vcvt.s32.f32 %v1090_v57 }
 0x2a7   : > { %v2668_v5 = vsel %vm990_vm5, %v1070_v58, 2147483647 }
 0x2a8   : > { %v999_v30 = vpop.xlane.xlu0 %998  ;;  %1093 = vmin.xlane.f32.xlu0 %v2665_v61  ;;  %v1105_v0 = vshra.s32 %v2668_v5, 16 }
 0x2a9   : > { %vm1052_vm9 = vcmp.ge.f32.partialorder %v2580_v59, %v999_v30 }
 0x2aa   : > { %v1071_v63 = vsel %vm1052_vm9, %v2655_v53, 8  ;;  %v2674_v3 = vcvt.s32.f32 %v1105_v0 }
 0x2ab   : > { %v2677_v55 = vsel %vm990_vm5, %v1071_v63, 2147483647 }
 0x2ac   : > { %v1002_v48 = vpop.xlane.xlu1 %1001  ;;  %1108 = vmin.xlane.f32.xlu1 %v2674_v3  ;;  %v1120_v6 = vshra.s32 %v2677_v55, 16 }
 0x2ad   : > { %vm1053_vm10 = vcmp.ge.f32.partialorder %v2584_v62, %v1002_v48 }
 0x2ae   : > { %v1072_v9 = vsel %vm1053_vm10, %v2655_v53, 8  ;;  %v2683_v8 = vcvt.s32.f32 %v1120_v6 }
 0x2af   : > { %v2686_v59 = vsel %vm990_vm5, %v1072_v9, 2147483647 }
 0x2b0   : > { %v1005_v10 = vpop.xlane.xlu0 %1004  ;;  %1123 = vmin.xlane.f32.xlu0 %v2683_v8  ;;  %v1135_v12 = vshra.s32 %v2686_v59, 16 }
 0x2b1   : > { %vm1054_vm11 = vcmp.ge.f32.partialorder %v2588_v2, %v1005_v10 }
 0x2b2   : > { %v1073_v32 = vsel %vm1054_vm11, %v2655_v53, 8  ;;  %v2692_v14 = vcvt.s32.f32 %v1135_v12 }
 0x2b3   : > { %v2695_v62 = vsel %vm990_vm5, %v1073_v32, 2147483647 }
 0x2b4   : > { %1138 = vmin.xlane.f32.xlu1 %v2692_v14  ;;  %v1150_v15 = vshra.s32 %v2695_v62, 16  ;;  %v1008_v52 = vpop.xlane.xlu1 %1007 }
 0x2b5   : > { %vm1055_vm12 = vcmp.ge.f32.partialorder %v2592_v4, %v1008_v52 }
 0x2b6   : > { %v2700_v18 = vcvt.s32.f32 %v1150_v15  ;;  %v1074_v17 = vsel %vm1055_vm12, %v2655_v53, 8 }
 0x2b7   : > { %v2704_v2 = vsel %vm990_vm5, %v1074_v17, 2147483647 }
 0x2b8   : > { %1153 = vmin.xlane.f32.xlu0 %v2700_v18  ;;  %v1011_v20 = vpop.xlane.xlu0 %1010  ;;  %v1165_v23 = vshra.s32 %v2704_v2, 16 }
 0x2b9   : > { %vm1056_vm13 = vcmp.ge.f32.partialorder %v2596_v7, %v1011_v20 }
 0x2ba   : > { %v1075_v24 = vsel %vm1056_vm13, %v2655_v53, 8  ;;  %v2710_v26 = vcvt.s32.f32 %v1165_v23 }
 0x2bb   : > { %v2713_v4 = vsel %vm990_vm5, %v1075_v24, 2147483647 }
 0x2bc   : > { %1168 = vmin.xlane.f32.xlu1 %v2710_v26  ;;  %v1014_v27 = vpop.xlane.xlu1 %1013  ;;  %v1180_v56 = vshra.s32 %v2713_v4, 16 }
 0x2bd   : > { %vm1057_vm14 = vcmp.ge.f32.partialorder %v2600_v11, %v1014_v27 }
 0x2be   : > { %v1076_v31 = vsel %vm1057_vm14, %v2655_v53, 8  ;;  %v2719_v33 = vcvt.s32.f32 %v1180_v56 }
 0x2bf   : > { %v2722_v7 = vsel %vm990_vm5, %v1076_v31, 2147483647 }
 0x2c0   : > { %1183 = vmin.xlane.f32.xlu0 %v2719_v33  ;;  %v1017_v25 = vpop.xlane.xlu0 %1016  ;;  %v1195_v37 = vshra.s32 %v2722_v7, 16 }
 0x2c1   : > { %vm1058_vm15 = vcmp.ge.f32.partialorder %v2604_v13, %v1017_v25 }
 0x2c2   : > { %v1077_v40 = vsel %vm1058_vm15, %v2655_v53, 8  ;;  %v2728_v39 = vcvt.s32.f32 %v1195_v37 }
 0x2c3   : > { %v2731_v11 = vsel %vm990_vm5, %v1077_v40, 2147483647 }
 0x2c4   : > { %1198 = vmin.xlane.f32.xlu1 %v2728_v39  ;;  %v1020_v29 = vpop.xlane.xlu1 %1019  ;;  %v1210_v41 = vshra.s32 %v2731_v11, 16 }
 0x2c5   : > { %vm1059_vm1 = vcmp.ge.f32.partialorder %v2608_v16, %v1020_v29 }
 0x2c6   : > { %v1078_v45 = vsel %vm1059_vm1, %v2655_v53, 8  ;;  %v2737_v46 = vcvt.s32.f32 %v1210_v41 }
 0x2c7   : > { %v2740_v13 = vsel %vm990_vm5, %v1078_v45, 2147483647 }
 0x2c8   : > { %1213 = vmin.xlane.f32.xlu0 %v2737_v46  ;;  %v1023_v35 = vpop.xlane.xlu0 %1022  ;;  %v1225_v49 = vshra.s32 %v2740_v13, 16 }
 0x2c9   : > { %vm1060_vm2 = vcmp.ge.f32.partialorder %v2612_v19, %v1023_v35 }
 0x2ca   : > { %v1079_v51 = vsel %vm1060_vm2, %v2655_v53, 8  ;;  %v2746_v54 = vcvt.s32.f32 %v1225_v49 }
 0x2cb   : > { %v2749_v16 = vsel %vm990_vm5, %v1079_v51, 2147483647 }
 0x2cc   : > { %1228 = vmin.xlane.f32.xlu1 %v2746_v54  ;;  %v1026_v42 = vpop.xlane.xlu1 %1025  ;;  %v1240_v44 = vshra.s32 %v2749_v16, 16 }
 0x2cd   : > { %vm1061_vm3 = vcmp.ge.f32.partialorder %v2616_v22, %v1026_v42 }
 0x2ce   : > { %v1080_v57 = vsel %vm1061_vm3, %v2655_v53, 8  ;;  %v2755_v58 = vcvt.s32.f32 %v1240_v44 }
 0x2cf   : > { %v2758_v19 = vsel %vm990_vm5, %v1080_v57, 2147483647 }
 0x2d0   : > { %1243 = vmin.xlane.f32.xlu0 %v2755_v58  ;;  %v1029_v30 = vpop.xlane.xlu0 %1028  ;;  %v1434_v0 = vpop.xlane.xlu1 %1433  ;;  %v1255_v63 = vshra.s32 %v2758_v19, 16 }
 0x2d1   : > { %vm1062_vm4 = vcmp.ge.f32.partialorder %v2627_v21, %v1029_v30  ;;  %v1435_v48 = vsub.f32 %v2621_v36, %v1434_v0 }
 0x2d2   : > { %v1081_v6 = vsel %vm1062_vm4, %v2655_v53, 8  ;;  %v2765_v22 = vcvt.s32.f32 %v1255_v63 }
 0x2d3   : > { %v2768_v9 = vsel %vm990_vm5, %v1081_v6, 2147483647  ;;  %v1436_v10 = vmul.f32 1.442695, %v1435_v48  ;;  %v1089_v6 = vand.u32 65535, %v2660_v50 }
 0x2d4   : > { %v1032_v12 = vpop.xlane.xlu0 %1031  ;;  %1258 = vmin.xlane.f32.xlu1 %v2765_v22  ;;  %v1270_v32 = vshra.s32 %v2768_v9, 16 }
 0x2d5   : > { %2174 = vpow2.f32 %v1436_v10  ;;  %vm1063_vm7 = vcmp.ge.f32.partialorder %v2631_v28, %v1032_v12  ;;  %v1104_v12 = vand.u32 65535, %v2668_v5  ;;  %v1134_v5 = vand.u32 65535, %v2686_v59 }
 0x2d6   : > { %v1082_v21 = vsel %vm1063_vm7, %v2655_v53, 8  ;;  %v2774_v15 = vcvt.s32.f32 %v1270_v32 }
 0x2d7   : > { %v2777_v36 = vsel %vm990_vm5, %v1082_v21, 2147483647 }
 0x2d8   : > { %1273 = vmin.xlane.f32.xlu0 %v2774_v15  ;;  %v1035_v52 = vpop.xlane.xlu1 %1034  ;;  %v1285_v17 = vshra.s32 %v2777_v36, 16 }
 0x2d9   : > { %vm1064_vm8 = vcmp.ge.f32.partialorder %v2635_v34, %v1035_v52  ;;  %v1106_v52 = vcvt.s32.f32 %v1104_v12 }
 0x2da   : > { %v1083_v20 = vsel %vm1064_vm8, %v2655_v53, 8  ;;  %v2783_v23 = vcvt.s32.f32 %v1285_v17  ;;  %v1119_v17 = vand.u32 65535, %v2677_v55  ;;  %v1149_v55 = vand.u32 65535, %v2695_v62 }
 0x2db   : > { %v2786_v28 = vsel %vm990_vm5, %v1083_v20, 2147483647  ;;  %v1179_v62 = vand.u32 65535, %v2713_v4  ;;  %v1209_v4 = vand.u32 65535, %v2731_v11  ;;  %v1239_v11 = vand.u32 65535, %v2749_v16 }
 0x2dc   : > { %v1038_v24 = vpop.xlane.xlu0 %1037  ;;  %1288 = vmin.xlane.f32.xlu1 %v2783_v23  ;;  %v1300_v27 = vshra.s32 %v2786_v28, 16  ;;  %v1269_v16 = vand.u32 65535, %v2768_v9  ;;  %v1299_v9 = vand.u32 65535, %v2786_v28 }
 0x2dd   : > { %vm1065_vm9 = vcmp.ge.f32.partialorder %v2639_v38, %v1038_v24  ;;  %v1121_v24 = vcvt.s32.f32 %v1119_v17  ;;  %v1241_v12 = vcvt.s32.f32 %v1239_v11 }
 0x2de   : > { %v1084_v56 = vsel %vm1065_vm9, %v2655_v53, 8  ;;  %v2792_v31 = vcvt.s32.f32 %v1300_v27 }
 0x2df   : > { %v2795_v34 = vsel %vm990_vm5, %v1084_v56, 2147483647  ;;  %v1136_v56 = vcvt.s32.f32 %v1134_v5 }
 0x2e0   : > { %1303 = vmin.xlane.f32.xlu0 %v2792_v31  ;;  %v1041_v25 = vpop.xlane.xlu1 %1040  ;;  %v1315_v37 = vshra.s32 %v2795_v34, 16 }
 0x2e1   : > { %vm1066_vm10 = vcmp.ge.f32.partialorder %v2643_v60, %v1041_v25 }
 0x2e2   : > { %v2800_v40 = vpop.eup %2174  ;;  %v1085_v29 = vsel %vm1066_vm10, %v2655_v53, 8  ;;  %v2803_v41 = vcvt.s32.f32 %v1315_v37  ;;  %v1151_v37 = vcvt.s32.f32 %v1149_v55 }
 0x2e3   : > { %v2806_v38 = vsel %vm990_vm5, %v1085_v29, 2147483647  ;;  %v1438_v45 = vsel %vm1431_vm6, %v2800_v40, 0.0 }
 0x2e4   : > { %v1044_v35 = vpop.xlane.xlu0 %1043  ;;  %1318 = vmin.xlane.f32.xlu1 %v2803_v41  ;;  %1439 = vadd.xlane.f32.xlu0 %v1438_v45  ;;  %v1330_v49 = vshra.s32 %v2806_v38, 16  ;;  %v1329_v28 = vand.u32 65535, %v2806_v38 }
 0x2e5   : > { %vm1067_vm11 = vcmp.ge.f32.partialorder %v2647_v43, %v1044_v35 }
 0x2e6   : > { %v1086_v60 = vsel %vm1067_vm11, %v2655_v53, 8  ;;  %v2814_v51 = vcvt.s32.f32 %v1330_v49  ;;  %v1181_v49 = vcvt.s32.f32 %v1179_v62 }
 0x2e7   : > { %v2817_v42 = vsel %vm990_vm5, %v1086_v60, 2147483647  ;;  %v1194_v60 = vand.u32 65535, %v2722_v7  ;;  %v1224_v7 = vand.u32 65535, %v2740_v13  ;;  %v1254_v13 = vand.u32 65535, %v2758_v19 }
 0x2e8   : > { %1333 = vmin.xlane.f32.xlu1 %v2814_v51  ;;  %v1047_v44 = vpop.xlane.xlu1 %1046  ;;  %v1345_v57 = vshra.s32 %v2817_v42, 16  ;;  %v1284_v19 = vand.u32 65535, %v2777_v36  ;;  %v1314_v36 = vand.u32 65535, %v2795_v34  ;;  %v1331_v34 = vcvt.s32.f32 %v1329_v28 }
 0x2e9   : > { %vm1068_vm12 = vcmp.ge.f32.partialorder %v2651_v47, %v1047_v44  ;;  %v1091_v47 = vcvt.s32.f32 %v1089_v6  ;;  %v1196_v44 = vcvt.s32.f32 %v1194_v60  ;;  %v1226_v6 = vcvt.s32.f32 %v1224_v7 }
 0x2ea   : > { %v1087_v30 = vsel %vm1068_vm12, %v2655_v53, 8  ;;  %v2823_v0 = vcvt.s32.f32 %v1345_v57  ;;  %v1286_v5 = vcvt.s32.f32 %v1284_v19 }
 0x2eb   : > { %v2826_v43 = vsel %vm990_vm5, %v1087_v30, 2147483647  ;;  %v1211_v30 = vcvt.s32.f32 %v1209_v4 }
 0x2ec   : > { %1348 = vmin.xlane.f32.xlu0 %v2823_v0  ;;  %v1360_v63 = vshra.s32 %v2826_v43, 16  ;;  %v1359_v38 = vand.u32 65535, %v2826_v43 }
 0x2ee   : > { %v2830_v48 = vcvt.s32.f32 %v1360_v63 }
 0x2f0   : > { %1363 = vmin.xlane.f32.xlu0 %v2830_v48 }
 0x331   : > { %v2834_v10 = vpop.xlane.xlu0 %1093 }
 0x332   : > { %vm1095_vm13 = vcmp.eq.f32.partialorder %v2665_v61, %v2834_v10 }
 0x333   : > { %v1096_v32 = vsel %vm1095_vm13, %v1091_v47, inf }
 0x334   : > { %1097 = vmin.xlane.f32.xlu1 %v1096_v32 }
 0x335   : > { %v2839_v21 = vpop.xlane.xlu1 %1108 }
 0x336   : > { %vm1110_vm14 = vcmp.eq.f32.partialorder %v2674_v3, %v2839_v21 }
 0x337   : > { %v1111_v20 = vsel %vm1110_vm14, %v1106_v52, inf  ;;  %v1256_v52 = vcvt.s32.f32 %v1254_v13 }
 0x338   : > { %1112 = vmin.xlane.f32.xlu1 %v1111_v20  ;;  %v1271_v20 = vcvt.s32.f32 %v1269_v16 }
 0x339   : > { %v2844_v50 = vpop.xlane.xlu0 %1123 }
 0x33a   : > { %vm1125_vm15 = vcmp.eq.f32.partialorder %v2683_v8, %v2844_v50  ;;  %v1164_v8 = vand.u32 65535, %v2704_v2 }
 0x33b   : > { %v1126_v61 = vsel %vm1125_vm15, %v1121_v24, inf }
 0x33c   : > { %1127 = vmin.xlane.f32.xlu0 %v1126_v61  ;;  %v1166_v45 = vcvt.s32.f32 %v1164_v8 }
 0x33d   : > { %v2849_v27 = vpop.xlane.xlu1 %1138 }
 0x33e   : > { %vm1140_vm1 = vcmp.eq.f32.partialorder %v2692_v14, %v2849_v27 }
 0x33f   : > { %v1141_v3 = vsel %vm1140_vm1, %v1136_v56, inf  ;;  %v1301_v56 = vcvt.s32.f32 %v1299_v9 }
 0x340   : > { %1142 = vmin.xlane.f32.xlu1 %v1141_v3 }
 0x341   : > { %v2854_v25 = vpop.xlane.xlu0 %1153 }
 0x342   : > { %vm1155_vm2 = vcmp.eq.f32.partialorder %v2700_v18, %v2854_v25 }
 0x343   : > { %v1156_v59 = vsel %vm1155_vm2, %v1151_v37, inf  ;;  %v1316_v37 = vcvt.s32.f32 %v1314_v36 }
 0x344   : > { %1157 = vmin.xlane.f32.xlu0 %v1156_v59  ;;  %v1344_v59 = vand.u32 65535, %v2817_v42 }
 0x345   : > { %v2859_v29 = vpop.xlane.xlu1 %1168 }
 0x346   : > { %vm1170_vm3 = vcmp.eq.f32.partialorder %v2710_v26, %v2859_v29  ;;  %v1346_v62 = vcvt.s32.f32 %v1344_v59 }
 0x347   : > { %v1171_v14 = vsel %vm1170_vm3, %v1166_v45, inf }
 0x348   : > { %1172 = vmin.xlane.f32.xlu1 %v1171_v14 }
 0x349   : > { %v2864_v35 = vpop.xlane.xlu0 %1183 }
 0x34a   : > { %vm1185_vm4 = vcmp.eq.f32.partialorder %v2719_v33, %v2864_v35  ;;  %v1190_v36 = vcvt.f32.s32 %v2864_v35 }
 0x34b   : > { %v1186_v18 = vsel %vm1185_vm4, %v1181_v49, inf  ;;  %v1361_v49 = vcvt.s32.f32 %v1359_v38 }
 0x34c   : > { %1187 = vmin.xlane.f32.xlu0 %v1186_v18  ;;  %v1100_v18 = vcvt.f32.s32 %v2834_v10  ;;  %v1191_v28 = vshll.u32 %v1190_v36, 16 }
 0x34d   : > { %v2869_v2 = vpop.xlane.xlu1 %1198 }
 0x34e   : > { %vm1200_vm7 = vcmp.eq.f32.partialorder %v2728_v39, %v2869_v2 }
 0x34f   : > { %v1201_v26 = vsel %vm1200_vm7, %v1196_v44, inf  ;;  %v1101_v44 = vshll.u32 %v1100_v18, 16 }
 0x350   : > { %1202 = vmin.xlane.f32.xlu1 %v1201_v26 }
 0x351   : > { %v2874_v57 = vpop.xlane.xlu0 %1213 }
 0x352   : > { %vm1215_vm8 = vcmp.eq.f32.partialorder %v2737_v46, %v2874_v57  ;;  %v1220_v38 = vcvt.f32.s32 %v2874_v57 }
 0x353   : > { %v1216_v33 = vsel %vm1215_vm8, %v1211_v30, inf }
 0x354   : > { %1217 = vmin.xlane.f32.xlu0 %v1216_v33  ;;  %v1130_v33 = vcvt.f32.s32 %v2844_v50 }
 0x355   : > { %v2879_v63 = vpop.xlane.xlu1 %1228 }
 0x356   : > { %vm1230_vm9 = vcmp.eq.f32.partialorder %v2746_v54, %v2879_v63  ;;  %v1131_v10 = vshll.u32 %v1130_v33, 16 }
 0x357   : > { %v1231_v39 = vsel %vm1230_vm9, %v1226_v6, inf }
 0x358   : > { %1232 = vmin.xlane.f32.xlu1 %v1231_v39 }
 0x359   : > { %v2884_v47 = vpop.xlane.xlu0 %1243 }
 0x35a   : > { %vm1245_vm10 = vcmp.eq.f32.partialorder %v2755_v58, %v2884_v47 }
 0x35b   : > { %v1246_v46 = vsel %vm1245_vm10, %v1241_v12, inf }
 0x35c   : > { %1247 = vmin.xlane.f32.xlu0 %v1246_v46 }
 0x35d   : > { %v2889_v32 = vpop.xlane.xlu1 %1258 }
 0x35e   : > { %vm1260_vm11 = vcmp.eq.f32.partialorder %v2765_v22, %v2889_v32 }
 0x35f   : > { %v1261_v54 = vsel %vm1260_vm11, %v1256_v52, inf  ;;  %v1160_v52 = vcvt.f32.s32 %v2854_v25 }
 0x360   : > { %1262 = vmin.xlane.f32.xlu1 %v1261_v54 }
 0x361   : > { %v2894_v17 = vpop.xlane.xlu0 %1273  ;;  %v1161_v19 = vshll.u32 %v1160_v52, 16 }
 0x362   : > { %vm1275_vm12 = vcmp.eq.f32.partialorder %v2774_v15, %v2894_v17 }
 0x363   : > { %v1276_v58 = vsel %vm1275_vm12, %v1271_v20, inf }
 0x364   : > { %1277 = vmin.xlane.f32.xlu0 %v1276_v58 }
 0x365   : > { %v2899_v24 = vpop.xlane.xlu1 %1288 }
 0x366   : > { %vm1290_vm13 = vcmp.eq.f32.partialorder %v2783_v23, %v2899_v24 }
 0x367   : > { %v1291_v22 = vsel %vm1290_vm13, %v1286_v5, inf  ;;  %v1175_v5 = vcvt.f32.s32 %v2859_v29 }
 0x368   : > { %1292 = vmin.xlane.f32.xlu1 %v1291_v22 }
 0x369   : > { %v2904_v61 = vpop.xlane.xlu0 %1303 }
 0x36a   : > { %vm1305_vm14 = vcmp.eq.f32.partialorder %v2792_v31, %v2904_v61 }
 0x36b   : > { %v1306_v15 = vsel %vm1305_vm14, %v1301_v56, inf  ;;  %v1176_v56 = vshll.u32 %v1175_v5, 16 }
 0x36c   : > { %1307 = vmin.xlane.f32.xlu0 %v1306_v15 }
 0x36d   : > { %v1440_v55 = vpop.xlane.xlu0 %1439  ;;  %v2909_v3 = vpop.xlane.xlu1 %1318 }
 0x36e   : > { %2176 = vrcp.f32 %v1440_v55  ;;  %vm1320_vm15 = vcmp.eq.f32.partialorder %v2803_v41, %v2909_v3 }
 0x36f   : > { %v1321_v23 = vsel %vm1320_vm15, %v1316_v37, inf }
 0x370   : > { %1322 = vmin.xlane.f32.xlu1 %v1321_v23  ;;  %v1205_v23 = vcvt.f32.s32 %v2869_v2 }
 0x371   : > { %v2914_v8 = vpop.xlane.xlu1 %1333 }
 0x372   : > { %vm1335_vm1 = vcmp.eq.f32.partialorder %v2814_v51, %v2914_v8 }
 0x373   : > { %v1336_v31 = vsel %vm1335_vm1, %v1331_v34, inf }
 0x374   : > { %1337 = vmin.xlane.f32.xlu0 %v1336_v31 }
 0x375   : > { %v2919_v45 = vpop.xlane.xlu0 %1348 }
 0x376   : > { %vm1350_vm2 = vcmp.eq.f32.partialorder %v2823_v0, %v2919_v45  ;;  %v1115_v0 = vcvt.f32.s32 %v2839_v21  ;;  %v1145_v21 = vcvt.f32.s32 %v2849_v27 }
 0x377   : > { %v1351_v41 = vsel %vm1350_vm2, %v1346_v62, inf  ;;  %v1206_v62 = vshll.u32 %v1205_v23, 16 }
 0x378   : > { %1352 = vmin.xlane.f32.xlu1 %v1351_v41  ;;  %v1116_v7 = vshll.u32 %v1115_v0, 16  ;;  %v1146_v46 = vshll.u32 %v1145_v21, 16  ;;  %v1280_v21 = vcvt.f32.s32 %v2894_v17 }
 0x379   : > { %v2924_v14 = vpop.xlane.xlu0 %1363 }
 0x37a   : > { %vm1365_vm3 = vcmp.eq.f32.partialorder %v2830_v48, %v2924_v14 }
 0x37b   : > { %v2177_v42 = vpop.eup %2176  ;;  %v1366_v51 = vsel %vm1365_vm3, %v1361_v49, inf }
 0x37c   : > { %1367 = vmin.xlane.f32.xlu0 %v1366_v51  ;;  %v1442_v60 = vmul.f32 %v2177_v42, %v2800_v40  ;;  %v1221_v51 = vshll.u32 %v1220_v38, 16  ;;  %v1370_v38 = vcvt.f32.s32 %v2924_v14 }
 0x37e   : > { %2025 = vmatpush3.msra.mxu1 %v1442_v60  ;;  %v1235_v60 = vcvt.f32.s32 %v2879_v63 }
 0x380   : > { %v1236_v0 = vshll.u32 %v1235_v60, 16 }
 0x3bd   : > { %v1098_v43 = vpop.xlane.xlu1 %1097 }
 0x3be   : > { %v1099_v4 = vcvt.f32.s32 %v1098_v43 }
 0x3c0   : > { %v1102_v26 = vadd.s32 %v1101_v44, %v1099_v4  ;;  %v1250_v4 = vcvt.f32.s32 %v2884_v47 }
 0x3c1   : > { %v1113_v30 = vpop.xlane.xlu1 %1112 }
 0x3c2   : > { %vm1373_vm4 = vcmp.eq.s32.totalorder %v2655_v53, %v1102_v26  ;;  %v1114_v48 = vcvt.f32.s32 %v1113_v30  ;;  %v1251_v33 = vshll.u32 %v1250_v4, 16 }
 0x3c3   : > { %v1782_v6 = vsel %vm1373_vm4, 1.0, %v2186_v1 }
 0x3c4   : > { %v1117_v11 = vadd.s32 %v1116_v7, %v1114_v48  ;;  %2027 = vmatmul.mubr.msk.f32.vlgmr.msra.gmra.mxu1 %vm990_vm5, %v1782_v6  ;;  %v1265_v48 = vcvt.f32.s32 %v2889_v32 }
 0x3c5   : > { %v1128_v40 = vpop.xlane.xlu0 %1127  ;;  %2029 = vmatprep.mubr.msk.f32.mxu1 %vm2187_vm0, %v2186_v1 }
 0x3c6   : > { %v1129_v39 = vcvt.f32.s32 %v1128_v40  ;;  %vm1374_vm7 = vcmp.eq.s32.totalorder %v2655_v53, %v1117_v11 }
 0x3c7   : > { %v1783_v50 = vsel %vm1374_vm7, 1.0, %v2186_v1 }
 0x3c8   : > { %v1132_v12 = vadd.s32 %v1131_v10, %v1129_v39  ;;  %2030 = vmatmul.mubr.msk.f32.gmra.mxu1 %vm990_vm5, %v1783_v50  ;;  %v1266_v10 = vshll.u32 %v1265_v48, 16 }
 0x3c9   : > { %v1143_v13 = vpop.xlane.xlu1 %1142  ;;  %2032 = vmatprep.mubr.msk.f32.mxu1 %vm2187_vm0, %v2186_v1 }
 0x3ca   : > { %v1144_v16 = vcvt.f32.s32 %v1143_v13  ;;  %vm1375_vm8 = vcmp.eq.s32.totalorder %v2655_v53, %v1132_v12  ;;  %v1281_v13 = vshll.u32 %v1280_v21, 16 }
 0x3cb   : > { %v1784_v27 = vsel %vm1375_vm8, 1.0, %v2186_v1 }
 0x3cc   : > { %v1147_v54 = vadd.s32 %v1146_v46, %v1144_v16  ;;  %2033 = vmatmul.mubr.msk.f32.gmra.mxu1 %vm990_vm5, %v1784_v27  ;;  %v1295_v46 = vcvt.f32.s32 %v2899_v24 }
 0x3cd   : > { %v1158_v20 = vpop.xlane.xlu0 %1157  ;;  %2035 = vmatprep.mubr.msk.f32.mxu1 %vm2187_vm0, %v2186_v1 }
 0x3ce   : > { %v1159_v58 = vcvt.f32.s32 %v1158_v20  ;;  %vm1376_vm9 = vcmp.eq.s32.totalorder %v2655_v53, %v1147_v54  ;;  %v1296_v54 = vshll.u32 %v1295_v46, 16  ;;  %v1310_v20 = vcvt.f32.s32 %v2904_v61 }
 0x3cf   : > { %v1785_v25 = vsel %vm1376_vm9, 1.0, %v2186_v1 }
 0x3d0   : > { %v1162_v9 = vadd.s32 %v1161_v19, %v1159_v58  ;;  %2036 = vmatmul.mubr.msk.f32.gmra.mxu1 %vm990_vm5, %v1785_v25  ;;  %v1311_v25 = vshll.u32 %v1310_v20, 16 }
 0x3d1   : > { %2038 = vmatprep.mubr.msk.f32.mxu1 %vm2187_vm0, %v2186_v1  ;;  %v1173_v22 = vpop.xlane.xlu1 %1172 }
 0x3d2   : > { %vm1377_vm10 = vcmp.eq.s32.totalorder %v2655_v53, %v1162_v9  ;;  %v1174_v15 = vcvt.f32.s32 %v1173_v22  ;;  %v1325_v9 = vcvt.f32.s32 %v2909_v3 }
 0x3d3   : > { %v1786_v55 = vsel %vm1377_vm10, 1.0, %v2186_v1 }
 0x3d4   : > { %2039 = vmatmul.mubr.msk.f32.gmra.mxu1 %vm990_vm5, %v1786_v55  ;;  %v1177_v29 = vadd.s32 %v1176_v56, %v1174_v15  ;;  %v1326_v15 = vshll.u32 %v1325_v9, 16  ;;  %v1340_v55 = vcvt.f32.s32 %v2914_v8 }
 0x3d5   : > { %2041 = vmatprep.mubr.msk.f32.mxu1 %vm2187_vm0, %v2186_v1  ;;  %v1188_v37 = vpop.xlane.xlu0 %1187 }
 0x3d6   : > { %v1189_v34 = vcvt.f32.s32 %v1188_v37  ;;  %vm1378_vm11 = vcmp.eq.s32.totalorder %v2655_v53, %v1177_v29  ;;  %v1341_v23 = vshll.u32 %v1340_v55, 16 }
 0x3d7   : > { %v1787_v59 = vsel %vm1378_vm11, 1.0, %v2186_v1 }
 0x3d8   : > { %v1192_v31 = vadd.s32 %v1191_v28, %v1189_v34  ;;  %2042 = vmatmul.mubr.msk.f32.gmra.mxu1 %vm990_vm5, %v1787_v59  ;;  %v1355_v34 = vcvt.f32.s32 %v2919_v45 }
 0x3d9   : > { %v1203_v35 = vpop.xlane.xlu1 %1202  ;;  %2044 = vmatprep.mubr.msk.f32.mxu1 %vm2187_vm0, %v2186_v1 }
 0x3da   : > { %v1204_v41 = vcvt.f32.s32 %v1203_v35  ;;  %vm1379_vm12 = vcmp.eq.s32.totalorder %v2655_v53, %v1192_v31 }
 0x3db   : > { %v1788_v2 = vsel %vm1379_vm12, 1.0, %v2186_v1 }
 0x3dc   : > { %v1207_v49 = vadd.s32 %v1206_v62, %v1204_v41  ;;  %2045 = vmatmul.mubr.msk.f32.gmra.mxu1 %vm990_vm5, %v1788_v2  ;;  %v1356_v62 = vshll.u32 %v1355_v34, 16 }
 0x3dd   : > { %v1218_v42 = vpop.xlane.xlu0 %1217  ;;  %2047 = vmatprep.mubr.msk.f32.mxu1 %vm2187_vm0, %v2186_v1 }
 0x3de   : > { %v1219_v18 = vcvt.f32.s32 %v1218_v42  ;;  %vm1380_vm13 = vcmp.eq.s32.totalorder %v2655_v53, %v1207_v49  ;;  %v1371_v42 = vshll.u32 %v1370_v38, 16 }
 0x3df   : > { %v1789_v57 = vsel %vm1380_vm13, 1.0, %v2186_v1 }
 0x3e0   : > { %v1222_v43 = vadd.s32 %v1221_v51, %v1219_v18  ;;  %2048 = vmatmul.mubr.msk.f32.gmra.mxu1 %vm990_vm5, %v1789_v57 }
 0x3e1   : > { %v1233_v44 = vpop.xlane.xlu1 %1232  ;;  %2050 = vmatprep.mubr.msk.f32.mxu1 %vm2187_vm0, %v2186_v1 }
 0x3e2   : > { %v1234_v26 = vcvt.f32.s32 %v1233_v44  ;;  %vm1381_vm14 = vcmp.eq.s32.totalorder %v2655_v53, %v1222_v43 }
 0x3e3   : > { %v1790_v63 = vsel %vm1381_vm14, 1.0, %v2186_v1 }
 0x3e4   : > { %v1237_v30 = vadd.s32 %v1236_v0, %v1234_v26  ;;  %2051 = vmatmul.mubr.msk.f32.gmra.mxu1 %vm990_vm5, %v1790_v63 }
 0x3e5   : > { %v1248_v7 = vpop.xlane.xlu0 %1247  ;;  %2053 = vmatprep.mubr.msk.f32.mxu1 %vm2187_vm0, %v2186_v1 }
 0x3e6   : > { %v1249_v6 = vcvt.f32.s32 %v1248_v7  ;;  %vm1382_vm15 = vcmp.eq.s32.totalorder %v2655_v53, %v1237_v30 }
 0x3e7   : > { %v1791_v47 = vsel %vm1382_vm15, 1.0, %v2186_v1 }
 0x3e8   : > { %v1252_v11 = vadd.s32 %v1251_v33, %v1249_v6  ;;  %2054 = vmatmul.mubr.msk.f32.gmra.mxu1 %vm990_vm5, %v1791_v47 }
 0x3e9   : > { %v1263_v40 = vpop.xlane.xlu1 %1262  ;;  %2056 = vmatprep.mubr.msk.f32.mxu1 %vm2187_vm0, %v2186_v1 }
 0x3ea   : > { %v1264_v39 = vcvt.f32.s32 %v1263_v40  ;;  %vm1383_vm1 = vcmp.eq.s32.totalorder %v2655_v53, %v1252_v11 }
 0x3eb   : > { %v1792_v32 = vsel %vm1383_vm1, 1.0, %v2186_v1 }
 0x3ec   : > { %v1267_v50 = vadd.s32 %v1266_v10, %v1264_v39  ;;  %2057 = vmatmul.mubr.msk.f32.gmra.mxu1 %vm990_vm5, %v1792_v32 }
 0x3ed   : > { %v1278_v12 = vpop.xlane.xlu0 %1277  ;;  %2059 = vmatprep.mubr.msk.f32.mxu1 %vm2187_vm0, %v2186_v1 }
 0x3ee   : > { %v1279_v52 = vcvt.f32.s32 %v1278_v12  ;;  %vm1384_vm2 = vcmp.eq.s32.totalorder %v2655_v53, %v1267_v50 }
 0x3ef   : > { %v1793_v17 = vsel %vm1384_vm2, 1.0, %v2186_v1 }
 0x3f0   : > { %v1282_v16 = vadd.s32 %v1281_v13, %v1279_v52  ;;  %2060 = vmatmul.mubr.msk.f32.gmra.mxu1 %vm990_vm5, %v1793_v17 }
 0x3f1   : > { %v1293_v27 = vpop.xlane.xlu1 %1292  ;;  %2062 = vmatprep.mubr.msk.f32.mxu1 %vm2187_vm0, %v2186_v1 }
 0x3f2   : > { %v1294_v19 = vcvt.f32.s32 %v1293_v27  ;;  %vm1385_vm3 = vcmp.eq.s32.totalorder %v2655_v53, %v1282_v16 }
 0x3f3   : > { %v1794_v24 = vsel %vm1385_vm3, 1.0, %v2186_v1 }
 0x3f4   : > { %v1297_v58 = vadd.s32 %v1296_v54, %v1294_v19  ;;  %2063 = vmatmul.mubr.msk.f32.gmra.mxu1 %vm990_vm5, %v1794_v24 }
 0x3f5   : > { %v1308_v5 = vpop.xlane.xlu0 %1307  ;;  %2065 = vmatprep.mubr.msk.f32.mxu1 %vm2187_vm0, %v2186_v1 }
 0x3f6   : > { %v1309_v22 = vcvt.f32.s32 %v1308_v5  ;;  %vm1386_vm4 = vcmp.eq.s32.totalorder %v2655_v53, %v1297_v58 }
 0x3f7   : > { %v1795_v61 = vsel %vm1386_vm4, 1.0, %v2186_v1 }
 0x3f8   : > { %v1312_v56 = vadd.s32 %v1311_v25, %v1309_v22  ;;  %2066 = vmatmul.mubr.msk.f32.gmra.mxu1 %vm990_vm5, %v1795_v61 }
 0x3f9   : > { %v1323_v36 = vpop.xlane.xlu1 %1322  ;;  %2068 = vmatprep.mubr.msk.f32.mxu1 %vm2187_vm0, %v2186_v1 }
 0x3fa   : > { %v1324_v29 = vcvt.f32.s32 %v1323_v36  ;;  %vm1387_vm7 = vcmp.eq.s32.totalorder %v2655_v53, %v1312_v56 }
 0x3fb   : > { %v1796_v3 = vsel %vm1387_vm7, 1.0, %v2186_v1 }
 0x3fc   : > { %v1327_v37 = vadd.s32 %v1326_v15, %v1324_v29  ;;  %2069 = vmatmul.mubr.msk.f32.gmra.mxu1 %vm990_vm5, %v1796_v3 }
 0x3fd   : > { %v1338_v28 = vpop.xlane.xlu0 %1337  ;;  %2071 = vmatprep.mubr.msk.f32.mxu1 %vm2187_vm0, %v2186_v1 }
 0x3fe   : > { %v1339_v59 = vcvt.f32.s32 %v1338_v28  ;;  %vm1388_vm8 = vcmp.eq.s32.totalorder %v2655_v53, %v1327_v37 }
 0x3ff   : > { %v1797_v8 = vsel %vm1388_vm8, 1.0, %v2186_v1 }
 0x400   : > { %v1342_v31 = vadd.s32 %v1341_v23, %v1339_v59  ;;  %2072 = vmatmul.mubr.msk.f32.gmra.mxu1 %vm990_vm5, %v1797_v8 }
 0x401   : > { %v1353_v35 = vpop.xlane.xlu1 %1352  ;;  %2074 = vmatprep.mubr.msk.f32.mxu1 %vm2187_vm0, %v2186_v1 }
 0x402   : > { %v1354_v41 = vcvt.f32.s32 %v1353_v35  ;;  %vm1389_vm9 = vcmp.eq.s32.totalorder %v2655_v53, %v1342_v31 }
 0x403   : > { %v1798_v45 = vsel %vm1389_vm9, 1.0, %v2186_v1 }
 0x404   : > { %v1357_v2 = vadd.s32 %v1356_v62, %v1354_v41  ;;  %2075 = vmatmul.mubr.msk.f32.gmra.mxu1 %vm990_vm5, %v1798_v45 }
 0x405   : > { %v1368_v49 = vpop.xlane.xlu0 %1367  ;;  %2077 = vmatprep.mubr.msk.f32.mxu1 %vm2187_vm0, %v2186_v1 }
 0x406   : > { %vm1390_vm10 = vcmp.eq.s32.totalorder %v2655_v53, %v1357_v2  ;;  %v1369_v51 = vcvt.f32.s32 %v1368_v49 }
 0x407   : > { %v1799_v60 = vsel %vm1390_vm10, 1.0, %v2186_v1 }
 0x408   : > { %v1372_v14 = vadd.s32 %v1371_v42, %v1369_v51  ;;  %2078 = vmatmul.mubr.msk.f32.gmra.mxu1 %vm990_vm5, %v1799_v60 }
 0x409   : > { %2080 = vmatprep.mubr.msk.f32.mxu1 %vm2187_vm0, %v2186_v1 }
 0x40a   : > { %vm1391_vm11 = vcmp.eq.s32.totalorder %v2655_v53, %v1372_v14 }
 0x40b   : > { %v1800_v18 = vsel %vm1391_vm11, 1.0, %v2186_v1 }
 0x40c   : > { %2081 = vmatmul.mubr.msk.f32.gmra.mxu1 %vm990_vm5, %v1800_v18 }
 0x484   : > { %v1566_v57 = vpop.f32.mrf.mxu1 }
 0x485   : > { %1660 = vst.msk [vmem:[%s3046_s29] sm:$0xff] %vm1431_vm6, %v1566_v57 }
 0x486   : > { %v2028_v53 = vpop.f32.mrf.mxu1 }
 0x488   : > { %v1571_v43 = vpop.f32.mrf.mxu1 }
 0x489   : > { %1661 = vst.msk [vmem:[%s3046_s29 + $0x8] sm:$0xff] %vm1431_vm6, %v1571_v43 }
 0x48a   : > { %v2031_v1 = vpop.f32.mrf.mxu1 }
 0x48c   : > { %v1576_v44 = vpop.f32.mrf.mxu1 }
 0x48d   : > { %1662 = vst.msk [vmem:[%s3046_s29 + $0x10] sm:$0xff] %vm1431_vm6, %v1576_v44 }
 0x48e   : > { %v2034_v0 = vpop.f32.mrf.mxu1 }
 0x490   : > { %v1581_v4 = vpop.f32.mrf.mxu1 }
 0x491   : > { %1663 = vst.msk [vmem:[%s3046_s29 + $0x18] sm:$0xff] %vm1431_vm6, %v1581_v4 }
 0x492   : > { %v2037_v26 = vpop.f32.mrf.mxu1 }
 0x494   : > { %v1586_v63 = vpop.f32.mrf.mxu1 }
 0x495   : > { %1664 = vst.msk [vmem:[%s3046_s29 + $0x20] sm:$0xff] %vm1431_vm6, %v1586_v63 }
 0x496   : > { %v2040_v30 = vpop.f32.mrf.mxu1 }
 0x498   : > { %v1591_v7 = vpop.f32.mrf.mxu1 }
 0x499   : > { %1665 = vst.msk [vmem:[%s3046_s29 + $0x28] sm:$0xff] %vm1431_vm6, %v1591_v7 }
 0x49a   : > { %v2043_v33 = vpop.f32.mrf.mxu1 }
 0x49c   : > { %v1596_v48 = vpop.f32.mrf.mxu1 }
 0x49d   : > { %1666 = vst.msk [vmem:[%s3046_s29 + $0x30] sm:$0xff] %vm1431_vm6, %v1596_v48 }
 0x49e   : > { %v2046_v6 = vpop.f32.mrf.mxu1 }
 0x4a0   : > { %v1601_v47 = vpop.f32.mrf.mxu1 }
 0x4a1   : > { %1667 = vst.msk [vmem:[%s3046_s29 + $0x38] sm:$0xff] %vm1431_vm6, %v1601_v47 }
 0x4a2   : > { %v2049_v11 = vpop.f32.mrf.mxu1 }
 0x4a4   : > { %v1606_v40 = vpop.f32.mrf.mxu1 }
 0x4a5   : > { %1668 = vst.msk [vmem:[%s3046_s29 + $0x40] sm:$0xff] %vm1431_vm6, %v1606_v40 }
 0x4a6   : > { %v2052_v10 = vpop.f32.mrf.mxu1 }
 0x4a8   : > { %v1611_v21 = vpop.f32.mrf.mxu1 }
 0x4a9   : > { %1669 = vst.msk [vmem:[%s3046_s29 + $0x48] sm:$0xff] %vm1431_vm6, %v1611_v21 }
 0x4aa   : > { %v2055_v39 = vpop.f32.mrf.mxu1 }
 0x4ac   : > { %v1616_v32 = vpop.f32.mrf.mxu1 }
 0x4ad   : > { %1670 = vst.msk [vmem:[%s3046_s29 + $0x50] sm:$0xff] %vm1431_vm6, %v1616_v32 }
 0x4ae   : > { %v2058_v50 = vpop.f32.mrf.mxu1 }
 0x4b0   : > { %v1621_v12 = vpop.f32.mrf.mxu1 }
 0x4b1   : > { %1671 = vst.msk [vmem:[%s3046_s29 + $0x58] sm:$0xff] %vm1431_vm6, %v1621_v12 }
 0x4b2   : > { %v2061_v13 = vpop.f32.mrf.mxu1 }
 0x4b4   : > { %v1626_v46 = vpop.f32.mrf.mxu1 }
 0x4b5   : > { %1672 = vst.msk [vmem:[%s3046_s29 + $0x60] sm:$0xff] %vm1431_vm6, %v1626_v46 }
 0x4b6   : > { %v2064_v52 = vpop.f32.mrf.mxu1 }
 0x4b8   : > { %v1631_v17 = vpop.f32.mrf.mxu1 }
 0x4b9   : > { %1673 = vst.msk [vmem:[%s3046_s29 + $0x68] sm:$0xff] %vm1431_vm6, %v1631_v17 }
 0x4ba   : > { %v2067_v16 = vpop.f32.mrf.mxu1 }
 0x4bc   : > { %v1636_v27 = vpop.f32.mrf.mxu1 }
 0x4bd   : > { %1674 = vst.msk [vmem:[%s3046_s29 + $0x70] sm:$0xff] %vm1431_vm6, %v1636_v27 }
 0x4be   : > { %v2070_v54 = vpop.f32.mrf.mxu1 }
 0x4c0   : > { %v1641_v20 = vpop.f32.mrf.mxu1 }
 0x4c1   : > { %1675 = vst.msk [vmem:[%s3046_s29 + $0x78] sm:$0xff] %vm1431_vm6, %v1641_v20 }
 0x4c2   : > { %v2073_v19 = vpop.f32.mrf.mxu1 }
 0x4c4   : > { %v1646_v24 = vpop.f32.mrf.mxu1 }
 0x4c5   : > { %1676 = vst.msk [vmem:[%s3046_s29 + $0x80] sm:$0xff] %vm1431_vm6, %v1646_v24 }
 0x4c6   : > { %v2076_v58 = vpop.f32.mrf.mxu1 }
 0x4c8   : > { %v1651_v5 = vpop.f32.mrf.mxu1 }
 0x4c9   : > { %1677 = vst.msk [vmem:[%s3046_s29 + $0x88] sm:$0xff] %vm1431_vm6, %v1651_v5 }
 0x4ca   : > { %v2079_v25 = vpop.f32.mrf.mxu1 }
 0x4cc   : > { %v1656_v9 = vpop.f32.mrf.mxu1 }
 0x4cd   : > { %1678 = vst.msk [vmem:[%s3046_s29 + $0x90] sm:$0xff] %vm1431_vm6, %v1656_v9 }
 0x4ce   : > { %v2082_v22 = vpop.f32.mrf.mxu1 }
 0x4cf PF: > { %s15_s18 = sadd.s32 1, %s2184_s18  }
 0x4d0   : > { %p12_p4 = scmp.ge.s32.totalorder %s15_s18, 4  }
 0x4d2   :  { %14 = sbr.rel (!%p12_p4) target bundleno = 1 (0x1), region = 70 }

</bundles_post_ra>
